<compile_context>
chip_gen: v7x
topology: tpu7x:2x2x1
jax: 0.10.0
libtpu: 0.0.40
codegen_flags: <defaults>
</compile_context>

<pallas_src>
import functools

import jax
import jax.numpy as jnp
from jax.experimental import pallas as pl
from jax.experimental.pallas import tpu as pltpu

CIN_PAD = 8    # f32 sublane tile: pad input channels so T_k blocks are tile-aligned
LANE = 128     # lane tile: pad node count so lane stores are unmasked


def _round_up(x, m):
    return ((x + m - 1) // m) * m


# ----------------------------------------------------------------------------
# Fused Pallas kernel: Chebyshev recursion + merged weights + bias + ReLU + head
# ----------------------------------------------------------------------------
def fused_cheb_kernel(l2_ref, x_ref, wt_ref, cb_ref, wh_ref, lb_ref, out_ref,
                      tcat_ref, h_ref, *, K, graphs_per_block):
    """One grid step processes `graphs_per_block` graphs.

    l2_ref:   [Fpad, Fpad]          bf16, 2*L_hat of ONE graph (shared topology)
    x_ref:    [BG*CIN_PAD, Fpad]    f32, T_0^T batch-stacked (rows = (graph, chan))
    wt_ref:   [C_out, K*CIN_PAD]    bf16 merged Chebyshev weights
    cb_ref:   [C_out, 1]            f32 ChebConv bias
    wh_ref:   [C_out, Fpad, O]      f32 classifier weights (shared across batch)
    lb_ref:   [1, O]                f32 classifier bias
    out_ref:  [BG, O]               f32 logits for this batch block
    tcat_ref: [BG, K*CIN_PAD, Fpad] f32 VMEM scratch holding all T_k
    h_ref:    [BG, C_out, Fpad]     f32 VMEM scratch, post-ReLU activations
    """
    BG = graphs_per_block
    CP = CIN_PAD
    fpad = x_ref.shape[1]
    c_out = wt_ref.shape[0]
    n_out = out_ref.shape[1]

    l2 = l2_ref[...]                                    # [Fpad, Fpad] bf16
    t0 = x_ref[...]                                     # [BG*CP, Fpad] f32

    # --- Chebyshev recursion, batch stacked into the M dimension -------------
    # T_k^T = T_{k-1}^T @ (2 L_hat) - T_{k-2}^T   (relies on symmetric L_hat)
    tcat_ref[:, 0:CP, :] = t0.reshape(BG, CP, fpad)
    if K > 1:
        t1 = 0.5 * jnp.dot(t0.astype(jnp.bfloat16), l2,
                           preferred_element_type=jnp.float32)
        tcat_ref[:, CP:2 * CP, :] = t1.reshape(BG, CP, fpad)
        t_pp, t_p = t0, t1
        for k in range(2, K):                           # static unroll
            t_c = jnp.dot(t_p.astype(jnp.bfloat16), l2,
                          preferred_element_type=jnp.float32) - t_pp
            tcat_ref[:, k * CP:(k + 1) * CP, :] = t_c.reshape(BG, CP, fpad)
            t_pp, t_p = t_p, t_c

    # --- Merged K-order weight contraction + bias + ReLU, per graph ----------
    wt = wt_ref[...]                                    # [C_out, K*CP] bf16
    cb = cb_ref[...]                                    # [C_out, 1] f32
    for b in range(BG):                                 # static unroll
        tb = tcat_ref[b].astype(jnp.bfloat16)           # [K*CP, Fpad]
        hb = jnp.dot(wt, tb, preferred_element_type=jnp.float32)  # [C_out, Fpad]
        h_ref[b] = jnp.maximum(hb + cb, 0.0)

    # --- Classifier head on the MXU, weights shared across the batch ---------
    # logits[b, o] = sum_co sum_f h[b, co, f] * wh[co, f, o] + lb[o]
    acc = jnp.zeros((BG, n_out), jnp.float32)
    for co in range(c_out):                             # static unroll
        acc = acc + jnp.dot(h_ref[:, co, :], wh_ref[co],
                            preferred_element_type=jnp.float32)
    out_ref[...] = acc + lb_ref[...]


# ----------------------------------------------------------------------------
# Host-side preparation (hoisted out of the per-forward path)
# ----------------------------------------------------------------------------
def build_scaled_laplacian(edge_index, edge_weight, num_nodes):
    """L_hat = (2/lambda_max)(I - D^{-1/2} A D^{-1/2}) - I, lambda_max=2
    => L_hat = -D^{-1/2} A D^{-1/2} (zero diagonal)."""
    row, col = edge_index[0], edge_index[1]
    A = jnp.zeros((num_nodes, num_nodes), jnp.float32).at[row, col].add(edge_weight)
    deg = A.sum(axis=1)
    dinv = jnp.where(deg > 0, jax.lax.rsqrt(deg), 0.0)
    return -(dinv[:, None] * A * dinv[None, :])


def prepare_graph(edge_index, n_features, fpad=None):
    """Shared-topology per-graph scaled Laplacian: one [Fpad, Fpad] bf16 block
    holding 2*L_hat (the factor 2 of the recursion folded in)."""
    fpad = fpad or _round_up(n_features, LANE)
    lhat = build_scaled_laplacian(
        edge_index, jnp.ones((edge_index.shape[1],), jnp.float32), n_features)
    # The in-kernel recursion uses T_k^T = T_{k-1}^T @ L_hat, valid only for
    # symmetric L_hat (undirected / bidirectional edge_index).
    if not bool(jnp.allclose(lhat, lhat.T, atol=1e-6)):
        raise ValueError("edge_index must describe an undirected (symmetric) graph")
    l2 = jnp.zeros((fpad, fpad), jnp.float32).at[:n_features, :n_features].set(2.0 * lhat)
    return l2.astype(jnp.bfloat16)


def prepare_params(params, *, n_features, fpad=None):
    """Re-layout weights once; independent of batch size."""
    K, cin, cout = params["cheb_w"].shape
    n_classes = params["lin_b"].shape[0]
    fpad = fpad or _round_up(n_features, LANE)

    wpad = jnp.zeros((K, CIN_PAD, cout), jnp.float32).at[:, :cin, :].set(params["cheb_w"])
    wt = jnp.transpose(wpad, (2, 0, 1)).reshape(cout, K * CIN_PAD).astype(jnp.bfloat16)
    cb = params["cheb_b"].reshape(cout, 1).astype(jnp.float32)

    w3 = params["lin_w"].reshape(n_features, cout, n_classes)        # [F, C, O]
    wh = jnp.zeros((cout, fpad, n_classes), jnp.float32).at[:, :n_features, :].set(
        jnp.transpose(w3, (1, 0, 2)))                                # [C, Fpad, O]
    lb = params["lin_b"].reshape(1, n_classes).astype(jnp.float32)
    return {"wt": wt, "cheb_b": cb, "wh": wh, "lin_b": lb}


# ----------------------------------------------------------------------------
# Forward wrapper
# ----------------------------------------------------------------------------
def chebconvnet_forward(x, l2, prep, *, n_features, K, graphs_per_block=8):
    n_nodes, cin = x.shape
    assert n_nodes % n_features == 0
    batch = n_nodes // n_features
    BG = min(graphs_per_block, batch)
    assert batch % BG == 0, "batch must be divisible by graphs_per_block"
    assert BG == batch or BG % 8 == 0, "graphs_per_block must be a multiple of 8 (or == batch)"

    fpad = l2.shape[0]
    cout = prep["cheb_b"].shape[0]
    n_classes = prep["lin_b"].shape[1]
    kc = K * CIN_PAD

    # T_0^T, feature-major and batch-stacked: rows = (graph, channel), lanes = nodes.
    x3 = jnp.transpose(x.reshape(batch, n_features, cin), (0, 2, 1))        # [B, Cin, F]
    xprep = jnp.zeros((batch, CIN_PAD, fpad), jnp.float32).at[:, :cin, :n_features].set(x3)
    xprep = xprep.reshape(batch * CIN_PAD, fpad)

    steps = batch // BG
    flops = steps * (2 * (K - 1) * BG * CIN_PAD * fpad * fpad      # recursion
                     + BG * 2 * cout * kc * fpad                   # merged weights
                     + cout * 2 * BG * fpad * n_classes)           # classifier head
    bytes_accessed = (l2.size * 2 + xprep.size * 4 + prep["wt"].size * 2
                      + prep["cheb_b"].size * 4 + prep["wh"].size * 4
                      + prep["lin_b"].size * 4 + batch * n_classes * 4)

    # Resident footprint (double-buffered blocks + scratch) -> scoped-VMEM limit.
    block_bytes = 2 * (l2.size * 2 + BG * CIN_PAD * fpad * 4 + prep["wt"].size * 2
                       + prep["cheb_b"].size * 4 + prep["wh"].size * 4
                       + prep["lin_b"].size * 4 + BG * n_classes * 4)
    scratch_bytes = BG * kc * fpad * 4 + BG * cout * fpad * 4
    vmem_limit = int(min(100 << 20, max(8 << 20, block_bytes + scratch_bytes + (2 << 20))))

    grid_spec = pltpu.PrefetchScalarGridSpec(
        num_scalar_prefetch=0,
        grid=(steps,),
        in_specs=[
            pl.BlockSpec((fpad, fpad), lambda i: (0, 0)),                  # L (constant)
            pl.BlockSpec((BG * CIN_PAD, fpad), lambda i: (i, 0)),          # T_0 block
            pl.BlockSpec((cout, kc), lambda i: (0, 0)),                    # merged cheb W
            pl.BlockSpec((cout, 1), lambda i: (0, 0)),                     # cheb bias
            pl.BlockSpec((cout, fpad, n_classes), lambda i: (0, 0, 0)),    # lin W (shared)
            pl.BlockSpec((1, n_classes), lambda i: (0, 0)),                # lin bias
        ],
        out_specs=pl.BlockSpec((BG, n_classes), lambda i: (i, 0)),
        scratch_shapes=[
            pltpu.VMEM((BG, kc, fpad), jnp.float32),       # all T_k, tile-aligned
            pltpu.VMEM((BG, cout, fpad), jnp.float32),     # post-ReLU activations
        ],
    )

    return pl.pallas_call(
        functools.partial(fused_cheb_kernel, K=K, graphs_per_block=BG),
        out_shape=jax.ShapeDtypeStruct((batch, n_classes), jnp.float32),
        grid_spec=grid_spec,
        compiler_params=pltpu.CompilerParams(
            dimension_semantics=("parallel",),
            vmem_limit_bytes=vmem_limit),
        cost_estimate=pl.CostEstimate(
            flops=flops, transcendentals=0, bytes_accessed=bytes_accessed),
    )(l2, xprep, prep["wt"], prep["cheb_b"], prep["wh"], prep["lin_b"])


# ----------------------------------------------------------------------------
# Pure-JAX f32 reference (original node-major, full batched graph)
# ----------------------------------------------------------------------------
def reference_forward(x, edge_index, params, *, n_features, n_channels):
    num_nodes = x.shape[0]
    lhat = build_scaled_laplacian(
        edge_index, jnp.ones((edge_index.shape[1],), jnp.float32), num_nodes)
    W, b = params["cheb_w"], params["cheb_b"]
    K = W.shape[0]
    tx0 = x
    out = tx0 @ W[0]
    if K > 1:
        tx1 = lhat @ tx0
        out = out + tx1 @ W[1]
        for k in range(2, K):
            tx2 = 2.0 * (lhat @ tx1) - tx0
            out = out + tx2 @ W[k]
            tx0, tx1 = tx1, tx2
    h = jnp.maximum(out + b[None, :], 0.0)
    h = h.reshape(num_nodes // n_features, n_features * n_channels)
    return h @ params["lin_w"] + params["lin_b"][None, :]


if __name__ == "__main__":
    # Model hyperparameters (small, consistent with the module).
    input_channels = 4    # node feature dim
    n_features = 16       # nodes per graph (fixed, shared topology)
    n_channels = 8        # ChebConv output channels
    n_classes = 3
    K = 3
    n_layers = 1          # only non-crashing config of the original module
    batch_size = 16       # -> grid of 2 blocks of 8 graphs
    graphs_per_block = 8
    num_nodes = batch_size * n_features

    key = jax.random.PRNGKey(0)
    k_x, k_w, k_b, k_lw, k_lb = jax.random.split(key, 5)

    # Node features for the batched (block-diagonal) graph.
    x = jax.random.normal(k_x, (num_nodes, input_channels), jnp.float32)

    # Per-graph topology: ring graph over n_features nodes, both directions.
    src, dst = [], []
    for i in range(n_features):
        a, b = i, (i + 1) % n_features
        src += [a, b]
        dst += [b, a]
    edge_index = jnp.array([src, dst], dtype=jnp.int32)           # [2, 32], one graph

    # Batched edge_index (for the reference on the full block-diagonal graph).
    batched_edge_index = jnp.concatenate(
        [edge_index + g * n_features for g in range(batch_size)], axis=1)

    # Parameters (deterministic init; shapes match the torch module).
    params = {
        "cheb_w": 0.1 * jax.random.normal(
            k_w, (K, input_channels, n_channels), jnp.float32),
        "cheb_b": 0.1 * jax.random.normal(k_b, (n_channels,), jnp.float32),
        "lin_w": 0.1 * jax.random.normal(
            k_lw, (n_features * n_channels, n_classes), jnp.float32),
        "lin_b": 0.1 * jax.random.normal(k_lb, (n_classes,), jnp.float32),
    }

    # Hoisted, reusable preprocessing (per topology / per parameter set; batch-independent).
    l2 = prepare_graph(edge_index, n_features)
    prep = prepare_params(params, n_features=n_features)

    out = chebconvnet_forward(
        x, l2, prep, n_features=n_features, K=K, graphs_per_block=graphs_per_block)
    out = jax.block_until_ready(out)

    ref = reference_forward(
        x, batched_edge_index, params, n_features=n_features, n_channels=n_channels)
    assert out.shape == (batch_size, n_classes)
    # Tolerance accounts for bf16 MXU operands (f32 accumulation) vs f32 reference.
    assert jnp.allclose(out, ref, rtol=2e-2, atol=2e-2)

    print("KERNEL_OK")
</pallas_src>

<mosaic_0001>
module attributes {stable_mosaic.version = 11 : i64} {
  func.func @fused_cheb_kernel(%arg0: i32, %arg1: memref<128x128xbf16, #tpu.memory_space<vmem>>, %arg2: memref<64x128xf32, #tpu.memory_space<vmem>>, %arg3: memref<8x24xbf16, #tpu.memory_space<vmem>>, %arg4: memref<8x1xf32, #tpu.memory_space<vmem>>, %arg5: memref<8x128x3xf32, #tpu.memory_space<vmem>>, %arg6: memref<1x3xf32, #tpu.memory_space<vmem>>, %arg7: memref<8x3xf32, #tpu.memory_space<vmem>>, %arg8: memref<8x24x128xf32, #tpu.memory_space<vmem>>, %arg9: memref<8x8x128xf32, #tpu.memory_space<vmem>>) attributes {dimension_semantics = [#tpu.dimension_semantics<parallel>], iteration_bounds = array<i64: 2>, scalar_prefetch = 0 : i64, scratch_operands = 2 : i64, tpu.core_type = #tpu.core_type<tc>, window_params = [{pipeline_mode = #tpu.pipeline_mode<synchronous>, transform_indices = @transform_0, window_bounds = array<i64: 128, 128>}, {transform_indices = @transform_1, window_bounds = array<i64: 64, 128>}, {pipeline_mode = #tpu.pipeline_mode<synchronous>, transform_indices = @transform_2, window_bounds = array<i64: 8, 24>}, {pipeline_mode = #tpu.pipeline_mode<synchronous>, transform_indices = @transform_3, window_bounds = array<i64: 8, 1>}, {pipeline_mode = #tpu.pipeline_mode<synchronous>, transform_indices = @transform_4, window_bounds = array<i64: 8, 128, 3>}, {pipeline_mode = #tpu.pipeline_mode<synchronous>, transform_indices = @transform_5, window_bounds = array<i64: 1, 3>}, {transform_indices = @transform_6, window_bounds = array<i64: 8, 3>}]} {
    %c0 = arith.constant 0 : index
    %c0_0 = arith.constant 0 : index
    %0 = vector.load %arg1[%c0, %c0_0] : memref<128x128xbf16, #tpu.memory_space<vmem>>, vector<128x128xbf16>
    %c0_1 = arith.constant 0 : index
    %c0_2 = arith.constant 0 : index
    %1 = vector.load %arg2[%c0_1, %c0_2] : memref<64x128xf32, #tpu.memory_space<vmem>>, vector<64x128xf32>
    %2 = vector.shape_cast %1 : vector<64x128xf32> to vector<8x8x128xf32>
    %c0_3 = arith.constant 0 : index
    %c0_4 = arith.constant 0 : index
    %c0_5 = arith.constant 0 : index
    %3 = vector.load %arg8[%c0_3, %c0_4, %c0_5] : memref<8x24x128xf32, #tpu.memory_space<vmem>>, vector<8x8x128xf32>
    tpu.vector_store %arg8[%c0_3, %c0_4, %c0_5], %2 {strides = array<i32>} : memref<8x24x128xf32, #tpu.memory_space<vmem>>, vector<8x8x128xf32>,
    %4 = arith.truncf %1 : vector<64x128xf32> to vector<64x128xbf16>
    %cst = arith.constant dense<0.000000e+00> : vector<64x128xf32>
    %5 = tpu.matmul %4, %0, %cst {dimension_numbers = #tpu.dot_dimension_numbers<[1], [0], [0], [1], [0, 0, 1, 1], [], []>} : vector<64x128xbf16>, vector<128x128xbf16>, vector<64x128xf32> -> vector<64x128xf32>
    %cst_6 = arith.constant 5.000000e-01 : f32
    %6 = vector.broadcast %cst_6 : f32 to vector<64x128xf32>
    %7 = arith.mulf %6, %5 : vector<64x128xf32>
    %8 = vector.shape_cast %7 : vector<64x128xf32> to vector<8x8x128xf32>
    %c0_7 = arith.constant 0 : index
    %c8 = arith.constant 8 : index
    %c0_8 = arith.constant 0 : index
    %9 = vector.load %arg8[%c0_7, %c8, %c0_8] : memref<8x24x128xf32, #tpu.memory_space<vmem>>, vector<8x8x128xf32>
    tpu.vector_store %arg8[%c0_7, %c8, %c0_8], %8 {strides = array<i32>} : memref<8x24x128xf32, #tpu.memory_space<vmem>>, vector<8x8x128xf32>,
    %10 = arith.truncf %7 : vector<64x128xf32> to vector<64x128xbf16>
    %cst_9 = arith.constant dense<0.000000e+00> : vector<64x128xf32>
    %11 = tpu.matmul %10, %0, %cst_9 {dimension_numbers = #tpu.dot_dimension_numbers<[1], [0], [0], [1], [0, 0, 1, 1], [], []>} : vector<64x128xbf16>, vector<128x128xbf16>, vector<64x128xf32> -> vector<64x128xf32>
    %12 = arith.subf %11, %1 : vector<64x128xf32>
    %13 = vector.shape_cast %12 : vector<64x128xf32> to vector<8x8x128xf32>
    %c0_10 = arith.constant 0 : index
    %c16 = arith.constant 16 : index
    %c0_11 = arith.constant 0 : index
    %14 = vector.load %arg8[%c0_10, %c16, %c0_11] : memref<8x24x128xf32, #tpu.memory_space<vmem>>, vector<8x8x128xf32>
    tpu.vector_store %arg8[%c0_10, %c16, %c0_11], %13 {strides = array<i32>} : memref<8x24x128xf32, #tpu.memory_space<vmem>>, vector<8x8x128xf32>,
    %c0_12 = arith.constant 0 : index
    %c0_13 = arith.constant 0 : index
    %15 = vector.load %arg3[%c0_12, %c0_13] : memref<8x24xbf16, #tpu.memory_space<vmem>>, vector<8x24xbf16>
    %c0_14 = arith.constant 0 : index
    %c0_15 = arith.constant 0 : index
    %16 = vector.load %arg4[%c0_14, %c0_15] : memref<8x1xf32, #tpu.memory_space<vmem>>, vector<8x1xf32>
    %c0_16 = arith.constant 0 : index
    %c0_17 = arith.constant 0 : index
    %c0_18 = arith.constant 0 : index
    %17 = vector.load %arg8[%c0_16, %c0_17, %c0_18] : memref<8x24x128xf32, #tpu.memory_space<vmem>>, vector<1x24x128xf32>
    %18 = vector.shape_cast %17 : vector<1x24x128xf32> to vector<24x128xf32>
    %19 = arith.truncf %18 : vector<24x128xf32> to vector<24x128xbf16>
    %cst_19 = arith.constant dense<0.000000e+00> : vector<8x128xf32>
    %20 = tpu.matmul %15, %19, %cst_19 {dimension_numbers = #tpu.dot_dimension_numbers<[1], [0], [0], [1], [0, 0, 1, 1], [], []>} : vector<8x24xbf16>, vector<24x128xbf16>, vector<8x128xf32> -> vector<8x128xf32>
    %21 = vector.broadcast %16 : vector<8x1xf32> to vector<8x128xf32>
    %22 = arith.addf %20, %21 : vector<8x128xf32>
    %cst_20 = arith.constant 0.000000e+00 : f32
    %23 = vector.broadcast %cst_20 : f32 to vector<8x128xf32>
    %24 = arith.maximumf %22, %23 : vector<8x128xf32>
    %c0_21 = arith.constant 0 : index
    %c0_22 = arith.constant 0 : index
    %c0_23 = arith.constant 0 : index
    %25 = vector.load %arg9[%c0_21, %c0_22, %c0_23] : memref<8x8x128xf32, #tpu.memory_space<vmem>>, vector<1x8x128xf32>
    %26 = vector.shape_cast %25 : vector<1x8x128xf32> to vector<8x128xf32>
    %27 = vector.shape_cast %24 : vector<8x128xf32> to vector<1x8x128xf32>
    tpu.vector_store %arg9[%c0_21, %c0_22, %c0_23], %27 {strides = array<i32>} : memref<8x8x128xf32, #tpu.memory_space<vmem>>, vector<1x8x128xf32>,
    %c1 = arith.constant 1 : index
    %c0_24 = arith.constant 0 : index
    %c0_25 = arith.constant 0 : index
    %28 = vector.load %arg8[%c1, %c0_24, %c0_25] : memref<8x24x128xf32, #tpu.memory_space<vmem>>, vector<1x24x128xf32>
    %29 = vector.shape_cast %28 : vector<1x24x128xf32> to vector<24x128xf32>
    %30 = arith.truncf %29 : vector<24x128xf32> to vector<24x128xbf16>
    %cst_26 = arith.constant dense<0.000000e+00> : vector<8x128xf32>
    %31 = tpu.matmul %15, %30, %cst_26 {dimension_numbers = #tpu.dot_dimension_numbers<[1], [0], [0], [1], [0, 0, 1, 1], [], []>} : vector<8x24xbf16>, vector<24x128xbf16>, vector<8x128xf32> -> vector<8x128xf32>
    %32 = vector.broadcast %16 : vector<8x1xf32> to vector<8x128xf32>
    %33 = arith.addf %31, %32 : vector<8x128xf32>
    %cst_27 = arith.constant 0.000000e+00 : f32
    %34 = vector.broadcast %cst_27 : f32 to vector<8x128xf32>
    %35 = arith.maximumf %33, %34 : vector<8x128xf32>
    %c1_28 = arith.constant 1 : index
    %c0_29 = arith.constant 0 : index
    %c0_30 = arith.constant 0 : index
    %36 = vector.load %arg9[%c1_28, %c0_29, %c0_30] : memref<8x8x128xf32, #tpu.memory_space<vmem>>, vector<1x8x128xf32>
    %37 = vector.shape_cast %36 : vector<1x8x128xf32> to vector<8x128xf32>
    %38 = vector.shape_cast %35 : vector<8x128xf32> to vector<1x8x128xf32>
    tpu.vector_store %arg9[%c1_28, %c0_29, %c0_30], %38 {strides = array<i32>} : memref<8x8x128xf32, #tpu.memory_space<vmem>>, vector<1x8x128xf32>,
    %c2 = arith.constant 2 : index
    %c0_31 = arith.constant 0 : index
    %c0_32 = arith.constant 0 : index
    %39 = vector.load %arg8[%c2, %c0_31, %c0_32] : memref<8x24x128xf32, #tpu.memory_space<vmem>>, vector<1x24x128xf32>
    %40 = vector.shape_cast %39 : vector<1x24x128xf32> to vector<24x128xf32>
    %41 = arith.truncf %40 : vector<24x128xf32> to vector<24x128xbf16>
    %cst_33 = arith.constant dense<0.000000e+00> : vector<8x128xf32>
    %42 = tpu.matmul %15, %41, %cst_33 {dimension_numbers = #tpu.dot_dimension_numbers<[1], [0], [0], [1], [0, 0, 1, 1], [], []>} : vector<8x24xbf16>, vector<24x128xbf16>, vector<8x128xf32> -> vector<8x128xf32>
    %43 = vector.broadcast %16 : vector<8x1xf32> to vector<8x128xf32>
    %44 = arith.addf %42, %43 : vector<8x128xf32>
    %cst_34 = arith.constant 0.000000e+00 : f32
    %45 = vector.broadcast %cst_34 : f32 to vector<8x128xf32>
    %46 = arith.maximumf %44, %45 : vector<8x128xf32>
    %c2_35 = arith.constant 2 : index
    %c0_36 = arith.constant 0 : index
    %c0_37 = arith.constant 0 : index
    %47 = vector.load %arg9[%c2_35, %c0_36, %c0_37] : memref<8x8x128xf32, #tpu.memory_space<vmem>>, vector<1x8x128xf32>
    %48 = vector.shape_cast %47 : vector<1x8x128xf32> to vector<8x128xf32>
    %49 = vector.shape_cast %46 : vector<8x128xf32> to vector<1x8x128xf32>
    tpu.vector_store %arg9[%c2_35, %c0_36, %c0_37], %49 {strides = array<i32>} : memref<8x8x128xf32, #tpu.memory_space<vmem>>, vector<1x8x128xf32>,
    %c3 = arith.constant 3 : index
    %c0_38 = arith.constant 0 : index
    %c0_39 = arith.constant 0 : index
    %50 = vector.load %arg8[%c3, %c0_38, %c0_39] : memref<8x24x128xf32, #tpu.memory_space<vmem>>, vector<1x24x128xf32>
    %51 = vector.shape_cast %50 : vector<1x24x128xf32> to vector<24x128xf32>
    %52 = arith.truncf %51 : vector<24x128xf32> to vector<24x128xbf16>
    %cst_40 = arith.constant dense<0.000000e+00> : vector<8x128xf32>
    %53 = tpu.matmul %15, %52, %cst_40 {dimension_numbers = #tpu.dot_dimension_numbers<[1], [0], [0], [1], [0, 0, 1, 1], [], []>} : vector<8x24xbf16>, vector<24x128xbf16>, vector<8x128xf32> -> vector<8x128xf32>
    %54 = vector.broadcast %16 : vector<8x1xf32> to vector<8x128xf32>
    %55 = arith.addf %53, %54 : vector<8x128xf32>
    %cst_41 = arith.constant 0.000000e+00 : f32
    %56 = vector.broadcast %cst_41 : f32 to vector<8x128xf32>
    %57 = arith.maximumf %55, %56 : vector<8x128xf32>
    %c3_42 = arith.constant 3 : index
    %c0_43 = arith.constant 0 : index
    %c0_44 = arith.constant 0 : index
    %58 = vector.load %arg9[%c3_42, %c0_43, %c0_44] : memref<8x8x128xf32, #tpu.memory_space<vmem>>, vector<1x8x128xf32>
    %59 = vector.shape_cast %58 : vector<1x8x128xf32> to vector<8x128xf32>
    %60 = vector.shape_cast %57 : vector<8x128xf32> to vector<1x8x128xf32>
    tpu.vector_store %arg9[%c3_42, %c0_43, %c0_44], %60 {strides = array<i32>} : memref<8x8x128xf32, #tpu.memory_space<vmem>>, vector<1x8x128xf32>,
    %c4 = arith.constant 4 : index
    %c0_45 = arith.constant 0 : index
    %c0_46 = arith.constant 0 : index
    %61 = vector.load %arg8[%c4, %c0_45, %c0_46] : memref<8x24x128xf32, #tpu.memory_space<vmem>>, vector<1x24x128xf32>
    %62 = vector.shape_cast %61 : vector<1x24x128xf32> to vector<24x128xf32>
    %63 = arith.truncf %62 : vector<24x128xf32> to vector<24x128xbf16>
    %cst_47 = arith.constant dense<0.000000e+00> : vector<8x128xf32>
    %64 = tpu.matmul %15, %63, %cst_47 {dimension_numbers = #tpu.dot_dimension_numbers<[1], [0], [0], [1], [0, 0, 1, 1], [], []>} : vector<8x24xbf16>, vector<24x128xbf16>, vector<8x128xf32> -> vector<8x128xf32>
    %65 = vector.broadcast %16 : vector<8x1xf32> to vector<8x128xf32>
    %66 = arith.addf %64, %65 : vector<8x128xf32>
    %cst_48 = arith.constant 0.000000e+00 : f32
    %67 = vector.broadcast %cst_48 : f32 to vector<8x128xf32>
    %68 = arith.maximumf %66, %67 : vector<8x128xf32>
    %c4_49 = arith.constant 4 : index
    %c0_50 = arith.constant 0 : index
    %c0_51 = arith.constant 0 : index
    %69 = vector.load %arg9[%c4_49, %c0_50, %c0_51] : memref<8x8x128xf32, #tpu.memory_space<vmem>>, vector<1x8x128xf32>
    %70 = vector.shape_cast %69 : vector<1x8x128xf32> to vector<8x128xf32>
    %71 = vector.shape_cast %68 : vector<8x128xf32> to vector<1x8x128xf32>
    tpu.vector_store %arg9[%c4_49, %c0_50, %c0_51], %71 {strides = array<i32>} : memref<8x8x128xf32, #tpu.memory_space<vmem>>, vector<1x8x128xf32>,
    %c5 = arith.constant 5 : index
    %c0_52 = arith.constant 0 : index
    %c0_53 = arith.constant 0 : index
    %72 = vector.load %arg8[%c5, %c0_52, %c0_53] : memref<8x24x128xf32, #tpu.memory_space<vmem>>, vector<1x24x128xf32>
    %73 = vector.shape_cast %72 : vector<1x24x128xf32> to vector<24x128xf32>
    %74 = arith.truncf %73 : vector<24x128xf32> to vector<24x128xbf16>
    %cst_54 = arith.constant dense<0.000000e+00> : vector<8x128xf32>
    %75 = tpu.matmul %15, %74, %cst_54 {dimension_numbers = #tpu.dot_dimension_numbers<[1], [0], [0], [1], [0, 0, 1, 1], [], []>} : vector<8x24xbf16>, vector<24x128xbf16>, vector<8x128xf32> -> vector<8x128xf32>
    %76 = vector.broadcast %16 : vector<8x1xf32> to vector<8x128xf32>
    %77 = arith.addf %75, %76 : vector<8x128xf32>
    %cst_55 = arith.constant 0.000000e+00 : f32
    %78 = vector.broadcast %cst_55 : f32 to vector<8x128xf32>
    %79 = arith.maximumf %77, %78 : vector<8x128xf32>
    %c5_56 = arith.constant 5 : index
    %c0_57 = arith.constant 0 : index
    %c0_58 = arith.constant 0 : index
    %80 = vector.load %arg9[%c5_56, %c0_57, %c0_58] : memref<8x8x128xf32, #tpu.memory_space<vmem>>, vector<1x8x128xf32>
    %81 = vector.shape_cast %80 : vector<1x8x128xf32> to vector<8x128xf32>
    %82 = vector.shape_cast %79 : vector<8x128xf32> to vector<1x8x128xf32>
    tpu.vector_store %arg9[%c5_56, %c0_57, %c0_58], %82 {strides = array<i32>} : memref<8x8x128xf32, #tpu.memory_space<vmem>>, vector<1x8x128xf32>,
    %c6 = arith.constant 6 : index
    %c0_59 = arith.constant 0 : index
    %c0_60 = arith.constant 0 : index
    %83 = vector.load %arg8[%c6, %c0_59, %c0_60] : memref<8x24x128xf32, #tpu.memory_space<vmem>>, vector<1x24x128xf32>
    %84 = vector.shape_cast %83 : vector<1x24x128xf32> to vector<24x128xf32>
    %85 = arith.truncf %84 : vector<24x128xf32> to vector<24x128xbf16>
    %cst_61 = arith.constant dense<0.000000e+00> : vector<8x128xf32>
    %86 = tpu.matmul %15, %85, %cst_61 {dimension_numbers = #tpu.dot_dimension_numbers<[1], [0], [0], [1], [0, 0, 1, 1], [], []>} : vector<8x24xbf16>, vector<24x128xbf16>, vector<8x128xf32> -> vector<8x128xf32>
    %87 = vector.broadcast %16 : vector<8x1xf32> to vector<8x128xf32>
    %88 = arith.addf %86, %87 : vector<8x128xf32>
    %cst_62 = arith.constant 0.000000e+00 : f32
    %89 = vector.broadcast %cst_62 : f32 to vector<8x128xf32>
    %90 = arith.maximumf %88, %89 : vector<8x128xf32>
    %c6_63 = arith.constant 6 : index
    %c0_64 = arith.constant 0 : index
    %c0_65 = arith.constant 0 : index
    %91 = vector.load %arg9[%c6_63, %c0_64, %c0_65] : memref<8x8x128xf32, #tpu.memory_space<vmem>>, vector<1x8x128xf32>
    %92 = vector.shape_cast %91 : vector<1x8x128xf32> to vector<8x128xf32>
    %93 = vector.shape_cast %90 : vector<8x128xf32> to vector<1x8x128xf32>
    tpu.vector_store %arg9[%c6_63, %c0_64, %c0_65], %93 {strides = array<i32>} : memref<8x8x128xf32, #tpu.memory_space<vmem>>, vector<1x8x128xf32>,
    %c7 = arith.constant 7 : index
    %c0_66 = arith.constant 0 : index
    %c0_67 = arith.constant 0 : index
    %94 = vector.load %arg8[%c7, %c0_66, %c0_67] : memref<8x24x128xf32, #tpu.memory_space<vmem>>, vector<1x24x128xf32>
    %95 = vector.shape_cast %94 : vector<1x24x128xf32> to vector<24x128xf32>
    %96 = arith.truncf %95 : vector<24x128xf32> to vector<24x128xbf16>
    %cst_68 = arith.constant dense<0.000000e+00> : vector<8x128xf32>
    %97 = tpu.matmul %15, %96, %cst_68 {dimension_numbers = #tpu.dot_dimension_numbers<[1], [0], [0], [1], [0, 0, 1, 1], [], []>} : vector<8x24xbf16>, vector<24x128xbf16>, vector<8x128xf32> -> vector<8x128xf32>
    %98 = vector.broadcast %16 : vector<8x1xf32> to vector<8x128xf32>
    %99 = arith.addf %97, %98 : vector<8x128xf32>
    %cst_69 = arith.constant 0.000000e+00 : f32
    %100 = vector.broadcast %cst_69 : f32 to vector<8x128xf32>
    %101 = arith.maximumf %99, %100 : vector<8x128xf32>
    %c7_70 = arith.constant 7 : index
    %c0_71 = arith.constant 0 : index
    %c0_72 = arith.constant 0 : index
    %102 = vector.load %arg9[%c7_70, %c0_71, %c0_72] : memref<8x8x128xf32, #tpu.memory_space<vmem>>, vector<1x8x128xf32>
    %103 = vector.shape_cast %102 : vector<1x8x128xf32> to vector<8x128xf32>
    %104 = vector.shape_cast %101 : vector<8x128xf32> to vector<1x8x128xf32>
    tpu.vector_store %arg9[%c7_70, %c0_71, %c0_72], %104 {strides = array<i32>} : memref<8x8x128xf32, #tpu.memory_space<vmem>>, vector<1x8x128xf32>,
    %cst_73 = arith.constant 0.000000e+00 : f32
    %105 = vector.broadcast %cst_73 : f32 to vector<8x3xf32>
    %c0_74 = arith.constant 0 : index
    %c0_75 = arith.constant 0 : index
    %c0_76 = arith.constant 0 : index
    %106 = vector.load %arg9[%c0_74, %c0_75, %c0_76] : memref<8x8x128xf32, #tpu.memory_space<vmem>>, vector<8x1x128xf32>
    %107 = vector.shape_cast %106 : vector<8x1x128xf32> to vector<8x128xf32>
    %c0_77 = arith.constant 0 : index
    %c0_78 = arith.constant 0 : index
    %c0_79 = arith.constant 0 : index
    %108 = vector.load %arg5[%c0_77, %c0_78, %c0_79] : memref<8x128x3xf32, #tpu.memory_space<vmem>>, vector<1x128x3xf32>
    %109 = vector.shape_cast %108 : vector<1x128x3xf32> to vector<128x3xf32>
    %cst_80 = arith.constant dense<0.000000e+00> : vector<8x3xf32>
    %110 = tpu.matmul %107, %109, %cst_80 {dimension_numbers = #tpu.dot_dimension_numbers<[1], [0], [0], [1], [0, 0, 1, 1], [], []>} : vector<8x128xf32>, vector<128x3xf32>, vector<8x3xf32> -> vector<8x3xf32>
    %111 = arith.addf %105, %110 : vector<8x3xf32>
    %c0_81 = arith.constant 0 : index
    %c1_82 = arith.constant 1 : index
    %c0_83 = arith.constant 0 : index
    %112 = vector.load %arg9[%c0_81, %c1_82, %c0_83] : memref<8x8x128xf32, #tpu.memory_space<vmem>>, vector<8x1x128xf32>
    %113 = vector.shape_cast %112 : vector<8x1x128xf32> to vector<8x128xf32>
    %c1_84 = arith.constant 1 : index
    %c0_85 = arith.constant 0 : index
    %c0_86 = arith.constant 0 : index
    %114 = vector.load %arg5[%c1_84, %c0_85, %c0_86] : memref<8x128x3xf32, #tpu.memory_space<vmem>>, vector<1x128x3xf32>
    %115 = vector.shape_cast %114 : vector<1x128x3xf32> to vector<128x3xf32>
    %cst_87 = arith.constant dense<0.000000e+00> : vector<8x3xf32>
    %116 = tpu.matmul %113, %115, %cst_87 {dimension_numbers = #tpu.dot_dimension_numbers<[1], [0], [0], [1], [0, 0, 1, 1], [], []>} : vector<8x128xf32>, vector<128x3xf32>, vector<8x3xf32> -> vector<8x3xf32>
    %117 = arith.addf %111, %116 : vector<8x3xf32>
    %c0_88 = arith.constant 0 : index
    %c2_89 = arith.constant 2 : index
    %c0_90 = arith.constant 0 : index
    %118 = vector.load %arg9[%c0_88, %c2_89, %c0_90] : memref<8x8x128xf32, #tpu.memory_space<vmem>>, vector<8x1x128xf32>
    %119 = vector.shape_cast %118 : vector<8x1x128xf32> to vector<8x128xf32>
    %c2_91 = arith.constant 2 : index
    %c0_92 = arith.constant 0 : index
    %c0_93 = arith.constant 0 : index
    %120 = vector.load %arg5[%c2_91, %c0_92, %c0_93] : memref<8x128x3xf32, #tpu.memory_space<vmem>>, vector<1x128x3xf32>
    %121 = vector.shape_cast %120 : vector<1x128x3xf32> to vector<128x3xf32>
    %cst_94 = arith.constant dense<0.000000e+00> : vector<8x3xf32>
    %122 = tpu.matmul %119, %121, %cst_94 {dimension_numbers = #tpu.dot_dimension_numbers<[1], [0], [0], [1], [0, 0, 1, 1], [], []>} : vector<8x128xf32>, vector<128x3xf32>, vector<8x3xf32> -> vector<8x3xf32>
    %123 = arith.addf %117, %122 : vector<8x3xf32>
    %c0_95 = arith.constant 0 : index
    %c3_96 = arith.constant 3 : index
    %c0_97 = arith.constant 0 : index
    %124 = vector.load %arg9[%c0_95, %c3_96, %c0_97] : memref<8x8x128xf32, #tpu.memory_space<vmem>>, vector<8x1x128xf32>
    %125 = vector.shape_cast %124 : vector<8x1x128xf32> to vector<8x128xf32>
    %c3_98 = arith.constant 3 : index
    %c0_99 = arith.constant 0 : index
    %c0_100 = arith.constant 0 : index
    %126 = vector.load %arg5[%c3_98, %c0_99, %c0_100] : memref<8x128x3xf32, #tpu.memory_space<vmem>>, vector<1x128x3xf32>
    %127 = vector.shape_cast %126 : vector<1x128x3xf32> to vector<128x3xf32>
    %cst_101 = arith.constant dense<0.000000e+00> : vector<8x3xf32>
    %128 = tpu.matmul %125, %127, %cst_101 {dimension_numbers = #tpu.dot_dimension_numbers<[1], [0], [0], [1], [0, 0, 1, 1], [], []>} : vector<8x128xf32>, vector<128x3xf32>, vector<8x3xf32> -> vector<8x3xf32>
    %129 = arith.addf %123, %128 : vector<8x3xf32>
    %c0_102 = arith.constant 0 : index
    %c4_103 = arith.constant 4 : index
    %c0_104 = arith.constant 0 : index
    %130 = vector.load %arg9[%c0_102, %c4_103, %c0_104] : memref<8x8x128xf32, #tpu.memory_space<vmem>>, vector<8x1x128xf32>
    %131 = vector.shape_cast %130 : vector<8x1x128xf32> to vector<8x128xf32>
    %c4_105 = arith.constant 4 : index
    %c0_106 = arith.constant 0 : index
    %c0_107 = arith.constant 0 : index
    %132 = vector.load %arg5[%c4_105, %c0_106, %c0_107] : memref<8x128x3xf32, #tpu.memory_space<vmem>>, vector<1x128x3xf32>
    %133 = vector.shape_cast %132 : vector<1x128x3xf32> to vector<128x3xf32>
    %cst_108 = arith.constant dense<0.000000e+00> : vector<8x3xf32>
    %134 = tpu.matmul %131, %133, %cst_108 {dimension_numbers = #tpu.dot_dimension_numbers<[1], [0], [0], [1], [0, 0, 1, 1], [], []>} : vector<8x128xf32>, vector<128x3xf32>, vector<8x3xf32> -> vector<8x3xf32>
    %135 = arith.addf %129, %134 : vector<8x3xf32>
    %c0_109 = arith.constant 0 : index
    %c5_110 = arith.constant 5 : index
    %c0_111 = arith.constant 0 : index
    %136 = vector.load %arg9[%c0_109, %c5_110, %c0_111] : memref<8x8x128xf32, #tpu.memory_space<vmem>>, vector<8x1x128xf32>
    %137 = vector.shape_cast %136 : vector<8x1x128xf32> to vector<8x128xf32>
    %c5_112 = arith.constant 5 : index
    %c0_113 = arith.constant 0 : index
    %c0_114 = arith.constant 0 : index
    %138 = vector.load %arg5[%c5_112, %c0_113, %c0_114] : memref<8x128x3xf32, #tpu.memory_space<vmem>>, vector<1x128x3xf32>
    %139 = vector.shape_cast %138 : vector<1x128x3xf32> to vector<128x3xf32>
    %cst_115 = arith.constant dense<0.000000e+00> : vector<8x3xf32>
    %140 = tpu.matmul %137, %139, %cst_115 {dimension_numbers = #tpu.dot_dimension_numbers<[1], [0], [0], [1], [0, 0, 1, 1], [], []>} : vector<8x128xf32>, vector<128x3xf32>, vector<8x3xf32> -> vector<8x3xf32>
    %141 = arith.addf %135, %140 : vector<8x3xf32>
    %c0_116 = arith.constant 0 : index
    %c6_117 = arith.constant 6 : index
    %c0_118 = arith.constant 0 : index
    %142 = vector.load %arg9[%c0_116, %c6_117, %c0_118] : memref<8x8x128xf32, #tpu.memory_space<vmem>>, vector<8x1x128xf32>
    %143 = vector.shape_cast %142 : vector<8x1x128xf32> to vector<8x128xf32>
    %c6_119 = arith.constant 6 : index
    %c0_120 = arith.constant 0 : index
    %c0_121 = arith.constant 0 : index
    %144 = vector.load %arg5[%c6_119, %c0_120, %c0_121] : memref<8x128x3xf32, #tpu.memory_space<vmem>>, vector<1x128x3xf32>
    %145 = vector.shape_cast %144 : vector<1x128x3xf32> to vector<128x3xf32>
    %cst_122 = arith.constant dense<0.000000e+00> : vector<8x3xf32>
    %146 = tpu.matmul %143, %145, %cst_122 {dimension_numbers = #tpu.dot_dimension_numbers<[1], [0], [0], [1], [0, 0, 1, 1], [], []>} : vector<8x128xf32>, vector<128x3xf32>, vector<8x3xf32> -> vector<8x3xf32>
    %147 = arith.addf %141, %146 : vector<8x3xf32>
    %c0_123 = arith.constant 0 : index
    %c7_124 = arith.constant 7 : index
    %c0_125 = arith.constant 0 : index
    %148 = vector.load %arg9[%c0_123, %c7_124, %c0_125] : memref<8x8x128xf32, #tpu.memory_space<vmem>>, vector<8x1x128xf32>
    %149 = vector.shape_cast %148 : vector<8x1x128xf32> to vector<8x128xf32>
    %c7_126 = arith.constant 7 : index
    %c0_127 = arith.constant 0 : index
    %c0_128 = arith.constant 0 : index
    %150 = vector.load %arg5[%c7_126, %c0_127, %c0_128] : memref<8x128x3xf32, #tpu.memory_space<vmem>>, vector<1x128x3xf32>
    %151 = vector.shape_cast %150 : vector<1x128x3xf32> to vector<128x3xf32>
    %cst_129 = arith.constant dense<0.000000e+00> : vector<8x3xf32>
    %152 = tpu.matmul %149, %151, %cst_129 {dimension_numbers = #tpu.dot_dimension_numbers<[1], [0], [0], [1], [0, 0, 1, 1], [], []>} : vector<8x128xf32>, vector<128x3xf32>, vector<8x3xf32> -> vector<8x3xf32>
    %153 = arith.addf %147, %152 : vector<8x3xf32>
    %c0_130 = arith.constant 0 : index
    %c0_131 = arith.constant 0 : index
    %154 = vector.load %arg6[%c0_130, %c0_131] : memref<1x3xf32, #tpu.memory_space<vmem>>, vector<1x3xf32>
    %155 = vector.broadcast %154 : vector<1x3xf32> to vector<8x3xf32>
    %156 = arith.addf %153, %155 : vector<8x3xf32>
    %c0_132 = arith.constant 0 : index
    %c0_133 = arith.constant 0 : index
    %157 = vector.load %arg7[%c0_132, %c0_133] : memref<8x3xf32, #tpu.memory_space<vmem>>, vector<8x3xf32>
    tpu.vector_store %arg7[%c0_132, %c0_133], %156 {strides = array<i32>} : memref<8x3xf32, #tpu.memory_space<vmem>>, vector<8x3xf32>,
    return
  }
  func.func @transform_0(%arg0: i32) -> (i32, i32) {
    %c0_i32 = arith.constant 0 : i32
    %c0_i32_0 = arith.constant 0 : i32
    %c0_i32_1 = arith.constant 0 : i32
    return %c0_i32, %c0_i32_0 : i32, i32
  }
  func.func @transform_1(%arg0: i32) -> (i32, i32) {
    %c0_i32 = arith.constant 0 : i32
    %c0_i32_0 = arith.constant 0 : i32
    return %arg0, %c0_i32 : i32, i32
  }
  func.func @transform_2(%arg0: i32) -> (i32, i32) {
    %c0_i32 = arith.constant 0 : i32
    %c0_i32_0 = arith.constant 0 : i32
    %c0_i32_1 = arith.constant 0 : i32
    return %c0_i32, %c0_i32_0 : i32, i32
  }
  func.func @transform_3(%arg0: i32) -> (i32, i32) {
    %c0_i32 = arith.constant 0 : i32
    %c0_i32_0 = arith.constant 0 : i32
    %c0_i32_1 = arith.constant 0 : i32
    return %c0_i32, %c0_i32_0 : i32, i32
  }
  func.func @transform_4(%arg0: i32) -> (i32, i32, i32) {
    %c0_i32 = arith.constant 0 : i32
    %c0_i32_0 = arith.constant 0 : i32
    %c0_i32_1 = arith.constant 0 : i32
    %c0_i32_2 = arith.constant 0 : i32
    return %c0_i32, %c0_i32_0, %c0_i32_1 : i32, i32, i32
  }
  func.func @transform_5(%arg0: i32) -> (i32, i32) {
    %c0_i32 = arith.constant 0 : i32
    %c0_i32_0 = arith.constant 0 : i32
    %c0_i32_1 = arith.constant 0 : i32
    return %c0_i32, %c0_i32_0 : i32, i32
  }
  func.func @transform_6(%arg0: i32) -> (i32, i32) {
    %c0_i32 = arith.constant 0 : i32
    %c0_i32_0 = arith.constant 0 : i32
    return %arg0, %c0_i32 : i32, i32
  }
}

</mosaic_0001>

<bundles_post_ra>
// kernel: tpu_custom_call.1
= control target key start
LH: loop header
LB: loop body
LE: loop exit
PB: predicated region body
PF: predicated region fallthrough
CT: control target
= control target key end

     0   :  { %s2923_s21 = smov 0   ;;  %s3675_s0 = inlined_call_operand.vmem [shape: bf16[128,128], index: 0, kind: input, shape index: {}]   ;;  %s3676_s1 = inlined_call_operand.vmem [shape: f32[128,128], index: 1, kind: input, shape index: {}]   ;;  %s3677_s2 = inlined_call_operand.vmem [shape: bf16[8,24], index: 2, kind: input, shape index: {}]   ;;  %s3678_s3 = inlined_call_operand.vmem [shape: f32[8,1], index: 3, kind: input, shape index: {}]   ;;  %s3679_s4 = inlined_call_operand.vmem [shape: f32[8,128,3], index: 4, kind: input, shape index: {}]   ;;  %s3680_s5 = inlined_call_operand.vmem [shape: f32[1,3], index: 5, kind: input, shape index: {}]   ;;  %s3681_s6 = inlined_call_operand.vmem [shape: f32[16,3], index: 6, kind: output, shape index: {}]  }
   0x1 LB: > { %s2929_s22 = sadd.s32 4294967295, %s2882_s21   ;;  %p1952_p0 = scmp.ge.s32.totalorder %s2882_s21, 1  ;;  %s2882_s21 = sphi %s2923_s21, %s16_s21  }
   0x2   : > { %p213_p1 = scmp.lt.s32.totalorder %s2882_s21, 3 }
   0x4   : > { %p214_p2 = pnand %p1952_p0, %p213_p1 }
   0x5   : > { %v2868_v0 = vld [vmem:[%s3675_s0] sm:$0xff] (!%p214_p2)   ;;  %s1953_s25 = sshll.u32 (!%p214_p2), %s2929_s22, 3  ;;  %v2869_v1 = vld [vmem:[%s3675_s0 + $0x8] sm:$0xff] (!%p214_p2)   ;;  %v2870_v2 = vld [vmem:[%s3675_s0 + $0x10] sm:$0xff] (!%p214_p2)   ;;  %v2884_v20 = vmov (!%p214_p2), 0.0   ;;  %vm2885_vm0 = vmmov (!%p214_p2), 0  }
   0x6   : > { %217 = sbr.rel (%p214_p2) target bundleno = 1047 (0x417), region = 44  ;;  %p243_p3 = scmp.lt.s32.totalorder (!%p214_p2), %s1953_s25, 15  ;;  %2271 = vmatprep.subr.bf16.mxu0 (!%p214_p2), %v2868_v0  ;;  %2295 = vmatprep.subr.bf16.mxu1 (!%p214_p2), %v2868_v0  ;;  %v2871_v3 = vld [vmem:[%s3675_s0 + $0x18] sm:$0xff] (!%p214_p2)   ;;  %v2872_v7 = vld [vmem:[%s3675_s0 + $0x20] sm:$0xff] (!%p214_p2)   ;;  %v2873_v8 = vld [vmem:[%s3675_s0 + $0x28] sm:$0xff] (!%p214_p2)   ;;  %v2886_v44 = vmov (!%p214_p2), 0  }
   0x7   : > { %2272 = vmatpush3.bf16.msra.mxu0 (!%p214_p2), %v2868_v0  ;;  %2296 = vmatpush3.bf16.msra.mxu1 (!%p214_p2), %v2868_v0  ;;  %v2874_v9 = vld [vmem:[%s3675_s0 + $0x30] sm:$0xff] (!%p214_p2)   ;;  %v2875_v10 = vld [vmem:[%s3675_s0 + $0x38] sm:$0xff] (!%p214_p2)   ;;  %v504_v43 = vld [vmem:[%s3678_s3] sm:$0xff] (!%p214_p2)  ;;  %vm519_vm1 = vcmask (!%p214_p2), 1043456   ;;  %vm515_vm2 = vcmask (!%p214_p2), 195584   ;;  %vm987_vm3 = vcmask (!%p214_p2), 1041409  }
   0x8   : > { %2273 = vmatprep.subr.bf16.mxu0 (!%p214_p2), %v2869_v1  ;;  %2297 = vmatprep.subr.bf16.mxu1 (!%p214_p2), %v2869_v1  ;;  %v3030_v55 = vld [vmem:[%s3677_s2] sm:$0xf] (!%p214_p2)  ;;  %vm990_vm4 = vcmask (!%p214_p2), 1042434   ;;  %vm993_vm5 = vcmask (!%p214_p2), 1043459   ;;  %vm996_vm6 = vcmask (!%p214_p2), 1044484   ;;  %vm999_vm7 = vcmask (!%p214_p2), 1045509  }
   0x9   : > { %2867 = vset.pattern.permute.xlu0 (!%p214_p2), %v2886_v44  ;;  %v944_v44 = vld [vmem:[%s3679_s4 + $0x38] sm:$0xff] (!%p214_p2)  ;;  %vm1002_vm8 = vcmask (!%p214_p2), 1046534   ;;  %vm1005_vm9 = vcmask (!%p214_p2), 1047559   ;;  %p248_p4 = scmp.lt.s32.totalorder (!%p214_p2), %s2929_s22, 1  ;;  %vm1893_vm10 = vcmask (!%p214_p2), 23552  }
   0xa   : > { %512 = vperm.xlu0 (!%p214_p2), %2867, %v504_v43  }
   0xb   : > { %2274 = vmatpush3.bf16.msra.mxu0 (!%p214_p2), %v2869_v1  ;;  %2298 = vmatpush3.bf16.msra.mxu1 (!%p214_p2), %v2869_v1 }
   0xc   : > { %2275 = vmatprep.subr.bf16.mxu0 (!%p214_p2), %v2870_v2  ;;  %2299 = vmatprep.subr.bf16.mxu1 (!%p214_p2), %v2870_v2 }
   0xd   : > { %s3683_s25 = smov (!%p243_p3, %s1953_s25), 15  ;;  %s3685_s22 = smov (!%p248_p4, %s2929_s22), 1 }
   0xe   : > { %s1954_s30 = sshll.u32 %s3683_s25, 3  ;;  %s1955_s16 = sshll.u32 %s3685_s22, 3 }
   0xf   : > { %s2946_s9 = scalar_lea.vmem %s3676_s1, %s1954_s30  ;;  %2276 = vmatpush3.bf16.msra.mxu0 %v2870_v2  ;;  %2300 = vmatpush3.bf16.msra.mxu1 %v2870_v2  ;;  %s251_s23 = scalar_lea.vmem %s3681_s6, %s1955_s16 }
  0x10   : > { %v2952_v4 = vld [vmem:[%s2946_s9] sm:$0xff]  ;;  %v2955_v5 = vld [vmem:[%s2946_s9 + $0x8] sm:$0xff]  ;;  %2277 = vmatprep.subr.bf16.mxu0 %v2871_v3  ;;  %2301 = vmatprep.subr.bf16.mxu1 %v2871_v3  ;;  %v2972_v11 = vld [vmem:[%s2946_s9 + $0x10] sm:$0xff] }
  0x11   : > { %v285_v6 = vpack.c.bf16 %v2955_v5, %v2952_v4  ;;  %v2975_v12 = vld [vmem:[%s2946_s9 + $0x18] sm:$0xff]  ;;  %v2978_v13 = vld [vmem:[%s2946_s9 + $0x20] sm:$0xff]  ;;  %v2981_v14 = vld [vmem:[%s2946_s9 + $0x28] sm:$0xff] }
  0x12   : > { %v286_v15 = vpack.c.bf16 %v2975_v12, %v2972_v11  ;;  %v287_v16 = vpack.c.bf16 %v2981_v14, %v2978_v13  ;;  %v2988_v17 = vld [vmem:[%s2946_s9 + $0x30] sm:$0xff]  ;;  %v2991_v18 = vld [vmem:[%s2946_s9 + $0x38] sm:$0xff] }
  0x13   : > { %2287 = vmatprep.mubr.bf16.mxu0 %v285_v6  ;;  %2278 = vmatpush3.bf16.msra.mxu0 %v2871_v3  ;;  %v288_v19 = vpack.c.bf16 %v2991_v18, %v2988_v17 }
  0x14   : > { %2279 = vmatprep.subr.bf16.mxu0 %v2872_v7  ;;  %2302 = vmatpush3.bf16.msra.mxu1 %v2871_v3 }
  0x15   : > { %2303 = vmatprep.subr.bf16.mxu1 %v2872_v7 }
  0x17   : > { %2280 = vmatpush3.bf16.msra.mxu0 %v2872_v7 }
  0x18   : > { %2281 = vmatprep.subr.bf16.mxu0 %v2873_v8  ;;  %2304 = vmatpush3.bf16.msra.mxu1 %v2872_v7 }
  0x19   : > { %2305 = vmatprep.subr.bf16.mxu1 %v2873_v8 }
  0x1b   : > { %2282 = vmatpush3.bf16.msra.mxu0 %v2873_v8 }
  0x1c   : > { %2283 = vmatprep.subr.bf16.mxu0 %v2874_v9  ;;  %2306 = vmatpush3.bf16.msra.mxu1 %v2873_v8 }
  0x1d   : > { %2307 = vmatprep.subr.bf16.mxu1 %v2874_v9 }
  0x1f   : > { %2284 = vmatpush3.bf16.msra.mxu0 %v2874_v9 }
  0x20   : > { %2285 = vmatprep.subr.bf16.mxu0 %v2875_v10  ;;  %2308 = vmatpush3.bf16.msra.mxu1 %v2874_v9 }
  0x21   : > { %2309 = vmatprep.subr.bf16.mxu1 %v2875_v10 }
  0x23   : > { %2286 = vmatpush3.bf16.msra.mxu0 %v2875_v10 }
  0x24   : > { %2310 = vmatpush3.bf16.msra.mxu1 %v2875_v10  ;;  %2319 = vmatprep.subr.bf16.mxu0 %v2884_v20 }
  0x25   : > { %2327 = vmatprep.subr.bf16.mxu1 %v2884_v20 }
  0x26   : > { %2288 = vmatmul.mubr.bf16.vlgmr.msra.gmra.mrb[0].mxu0 %v286_v15 }
  0x27   : > { %2291 = vmatprep.mubr.bf16.mxu0 %v287_v16 }
  0x2e   : > { %2292 = vmatmul.mubr.bf16.gmra.mrb[4].mxu0 %v288_v19 }
  0x2f   : > { %2323 = vmatprep.mubr.msk.bf16.mxu0 %vm2885_vm0, %v2884_v20 }
  0xf9   : > { %v2289_v21 = vpop.f32.mrb[0].mxu0 }
  0xfa   : > { %v371_v22 = vpop.f32.mrb[1].mxu0  ;;  %v404_v25 = vmul.f32 0.5, %v2289_v21  ;;  %v1972_v21 = vld [vmem:[%s3679_s4 + $0x80] sm:$0xff] }
  0xfb   : > { %v402_v23 = vmul.f32 0.5, %v371_v22  ;;  %v2290_v24 = vpop.f32.mrb[2].mxu0  ;;  %v1973_v22 = vld [vmem:[%s3679_s4 + $0x88] sm:$0xff] }
  0xfc   : > { %v2997_v26 = vmul.f32 0.5, %v2290_v24  ;;  %v374_v27 = vpop.f32.mrb[3].mxu0  ;;  %v621_v59 = vpack.c.bf16 %v404_v25, %v2972_v11  ;;  %v2664_v24 = vpack.c.bf16 %v1973_v22, %v1972_v21 }
  0xfd   : > { %v508_v28 = vpack.c.bf16 %v402_v23, %v2952_v4  ;;  %v403_v29 = vmul.f32 0.5, %v374_v27 }
  0xfe   : > { %v419_v30 = vpack.c.bf16 %v2997_v26, %v404_v25  ;;  %v673_v63 = vpack.c.bf16 %v2997_v26, %v2975_v12  ;;  %v938_v25 = vld [vmem:[%s3679_s4 + $0x8] sm:$0xff]  ;;  %v2887_v26 = vmov 0.0|0.0  }
  0xff   : > { %v569_v31 = vpack.c.bf16 %v403_v29, %v2955_v5  ;;  %2320 = vmatpush3.bf16.msra.mxu0 %v508_v28  ;;  %v418_v32 = vpack.c.bf16 %v403_v29, %v402_v23  ;;  %v937_v23 = vld [vmem:[%s3679_s4] sm:$0xff]  ;;  %v1974_v28 = vld [vmem:[%s3679_s4 + $0x90] sm:$0xff]  ;;  %v1975_v29 = vld [vmem:[%s3679_s4 + $0x98] sm:$0xff] }
 0x100   : > { %2321 = vmatprep.subr.bf16.mxu0 %v2884_v20  ;;  %v2688_v27 = vpack.c.bf16 %v938_v25, %v937_v23 }
 0x101   : > { %2311 = vmatprep.mubr.bf16.mxu1 %v418_v32  ;;  %v2293_v33 = vpop.f32.mrb[4].mxu0  ;;  %v940_v32 = vld [vmem:[%s3679_s4 + $0x18] sm:$0xff] }
 0x102   : > { %2312 = vmatmul.mubr.bf16.vlgmr.msra.gmra.mrb[0].mxu1 %v419_v30  ;;  %v3003_v34 = vmul.f32 0.5, %v2293_v33  ;;  %v387_v35 = vpop.f32.mrb[5].mxu0  ;;  %v939_v30 = vld [vmem:[%s3679_s4 + $0x10] sm:$0xff] }
 0x103   : > { %2328 = vmatpush3.bf16.msra.mxu1 %v569_v31  ;;  %v3005_v36 = vmul.f32 0.5, %v387_v35  ;;  %v2294_v37 = vpop.f32.mrb[6].mxu0  ;;  %v2667_v31 = vpack.c.bf16 %v1975_v29, %v1974_v28  ;;  %v2691_v33 = vpack.c.bf16 %v940_v32, %v939_v30  ;;  %v1977_v35 = vld [vmem:[%s3679_s4 + $0xa8] sm:$0xff] }
 0x104   : > { %v3007_v38 = vmul.f32 0.5, %v2294_v37  ;;  %v390_v39 = vpop.f32.mrb[7].mxu0  ;;  %2329 = vmatprep.subr.bf16.mxu1 %v2884_v20 }
 0x105   : > { %v3010_v40 = vmul.f32 0.5, %v390_v39  ;;  %v725_v6 = vpack.c.bf16 %v3005_v36, %v2978_v13 }
 0x106   : > { %v421_v41 = vpack.c.bf16 %v3007_v38, %v3003_v34  ;;  %v881_v16 = vpack.c.bf16 %v3007_v38, %v2991_v18  ;;  %v942_v38 = vld [vmem:[%s3679_s4 + $0x28] sm:$0xff] }
 0x107   : > { %v420_v42 = vpack.c.bf16 %v3010_v40, %v3005_v36  ;;  %v777_v8 = vpack.c.bf16 %v3010_v40, %v2981_v14  ;;  %v941_v36 = vld [vmem:[%s3679_s4 + $0x20] sm:$0xff]  ;;  %v1978_v40 = vld [vmem:[%s3679_s4 + $0xb0] sm:$0xff] }
 0x108   : > { %v2694_v39 = vpack.c.bf16 %v942_v38, %v941_v36 }
 0x109   : > { %2315 = vmatprep.mubr.bf16.mxu1 %v420_v42  ;;  %v943_v42 = vld [vmem:[%s3679_s4 + $0x30] sm:$0xff] }
 0x10a   : > { %2316 = vmatmul.mubr.bf16.gmra.mrb[4].mxu1 %v421_v41  ;;  %v1979_v41 = vld [vmem:[%s3679_s4 + $0xb8] sm:$0xff] }
 0x10b   : > { %2331 = vmatprep.mubr.msk.bf16.mxu1 %vm2885_vm0, %v2884_v20  ;;  %v2673_v43 = vpack.c.bf16 %v1979_v41, %v1978_v40 }
 0x1d5   : > { %v2313_v45 = vpop.f32.mrb[0].mxu1 }
 0x1d6   : > { %v456_v46 = vpop.f32.mrb[1].mxu1  ;;  %v489_v52 = vsub.f32 %v2313_v45, %v2972_v11  ;;  %v2697_v45 = vpack.c.bf16 %v944_v44, %v943_v42 }
 0x1d7   : > { %v487_v47 = vsub.f32 %v456_v46, %v2952_v4  ;;  %v2314_v48 = vpop.f32.mrb[2].mxu1  ;;  %v1980_v46 = vld [vmem:[%s3679_s4 + $0xc0] sm:$0xff] }
 0x1d8   : > { %v459_v49 = vpop.f32.mrb[3].mxu1  ;;  %v490_v56 = vsub.f32 %v2314_v48, %v2975_v12  ;;  %v622_v61 = vpack.c.bf16 %v489_v52, %v489_v52  ;;  %v945_v48 = vld [vmem:[%s3679_s4 + $0x40] sm:$0xff]  ;;  %v1982_v52 = vld [vmem:[%s3679_s4 + $0xd0] sm:$0xff] }
 0x1d9   : > { %v509_v50 = vpack.c.bf16 %v487_v47, %v487_v47  ;;  %v488_v51 = vsub.f32 %v459_v49, %v2955_v5  ;;  %v1981_v47 = vld [vmem:[%s3679_s4 + $0xc8] sm:$0xff] }
 0x1da   : > { %v674_v1 = vpack.c.bf16 %v490_v56, %v490_v56  ;;  %v624_v2 = vsel %vm519_vm1, %v622_v61, 0  ;;  %v2676_v49 = vpack.c.bf16 %v1981_v47, %v1980_v46  ;;  %v948_v56 = vld [vmem:[%s3679_s4 + $0x58] sm:$0xff] }
 0x1db   : > { %v521_v53 = vsel %vm519_vm1, %v509_v50, 0  ;;  %v570_v54 = vpack.c.bf16 %v488_v51, %v488_v51  ;;  %v946_v50 = vld [vmem:[%s3679_s4 + $0x48] sm:$0xff] }
 0x1dc   : > { %2322 = vmatpush3.bf16.msra.mxu0 %v521_v53  ;;  %v676_v4 = vsel %vm519_vm1, %v674_v1, 0  ;;  %v2700_v51 = vpack.c.bf16 %v946_v50, %v945_v48  ;;  %v1983_v53 = vld [vmem:[%s3679_s4 + $0xd8] sm:$0xff] }
 0x1dd   : > { %v572_v57 = vsel %vm519_vm1, %v570_v54, 0  ;;  %2335 = vmatprep.subr.bf16.mxu0 %v2884_v20  ;;  %v2317_v58 = vpop.f32.mrb[4].mxu1  ;;  %v947_v54 = vld [vmem:[%s3679_s4 + $0x50] sm:$0xff] }
 0x1de   : > { %2330 = vmatpush3.bf16.msra.mxu1 %v572_v57  ;;  %v472_v60 = vpop.f32.mrb[5].mxu1  ;;  %v493_v10 = vsub.f32 %v2317_v58, %v2988_v17  ;;  %v2703_v57 = vpack.c.bf16 %v948_v56, %v947_v54  ;;  %v1984_v58 = vld [vmem:[%s3679_s4 + $0xe0] sm:$0xff] }
 0x1df   : > { %2324 = vmatmul.mubr.msk.bf16.vlgmr.msra.gmra.mrb[8].mxu0 %vm515_vm2, %v3030_v55  ;;  %2343 = vmatprep.subr.bf16.mxu1 %v2884_v20  ;;  %v2318_v62 = vpop.f32.mrb[6].mxu1  ;;  %v491_v3 = vsub.f32 %v472_v60, %v2978_v13  ;;  %v949_v60 = vld [vmem:[%s3679_s4 + $0x60] sm:$0xff] }
 0x1e0   : > { %2336 = vmatpush3.bf16.msra.mxu0 %v621_v59  ;;  %v475_v0 = vpop.f32.mrb[7].mxu1  ;;  %2339 = vmatprep.mubr.msk.bf16.mxu0 %vm2885_vm0, %v2884_v20  ;;  %v494_v12 = vsub.f32 %v2318_v62, %v2991_v18  ;;  %v830_v15 = vpack.c.bf16 %v493_v10, %v493_v10  ;;  %v1985_v59 = vld [vmem:[%s3679_s4 + $0xe8] sm:$0xff] }
 0x1e1   : > { %2332 = vmatmul.mubr.msk.bf16.vlgmr.msra.gmra.mrb[8].mxu1 %vm515_vm2, %v3030_v55  ;;  %2337 = vmatprep.subr.bf16.mxu0 %v2884_v20  ;;  %v492_v5 = vsub.f32 %v475_v0, %v2981_v14  ;;  %v726_v7 = vpack.c.bf16 %v491_v3, %v491_v3  ;;  %v829_v14 = vpack.c.bf16 %v3003_v34, %v2988_v17  ;;  %v1976_v34 = vld [vmem:[%s3679_s4 + $0xa0] sm:$0xff]  ;;  %v950_v62 = vld [vmem:[%s3679_s4 + $0x68] sm:$0xff]  ;;  %v1987_v0 = vld [vmem:[%s3679_s4 + $0xf8] sm:$0xff] }
 0x1e2   : > { %2344 = vmatpush3.bf16.msra.mxu1 %v673_v63  ;;  %2347 = vmatprep.mubr.msk.bf16.mxu1 %vm2885_vm0, %v2884_v20  ;;  %v882_v19 = vpack.c.bf16 %v494_v12, %v494_v12  ;;  %v832_v17 = vsel %vm519_vm1, %v830_v15, 0  ;;  %v2670_v37 = vpack.c.bf16 %v1977_v35, %v1976_v34  ;;  %v2682_v61 = vpack.c.bf16 %v1985_v59, %v1984_v58  ;;  %v1986_v63 = vld [vmem:[%s3679_s4 + $0xf0] sm:$0xff]  ;;  %v952_v3 = vld [vmem:[%s3679_s4 + $0x78] sm:$0xff] }
 0x1e3   : > { %2345 = vmatprep.subr.bf16.mxu1 %v2884_v20  ;;  %v778_v9 = vpack.c.bf16 %v492_v5, %v492_v5  ;;  %v728_v11 = vsel %vm519_vm1, %v726_v7, 0  ;;  %v2706_v1 = vpack.c.bf16 %v950_v62, %v949_v60 }
 0x1e4   : > { %2338 = vmatpush3.bf16.msra.mxu0 %v624_v2  ;;  %v884_v18 = vsel %vm519_vm1, %v882_v19, 0  ;;  %v951_v2 = vld [vmem:[%s3679_s4 + $0x70] sm:$0xff] }
 0x1e5   : > { %2351 = vmatprep.subr.bf16.mxu0 %v2884_v20  ;;  %v780_v13 = vsel %vm519_vm1, %v778_v9, 0  ;;  %v2709_v5 = vpack.c.bf16 %v952_v3, %v951_v2 }
 0x1e6   : > { %2346 = vmatpush3.bf16.msra.mxu1 %v676_v4  ;;  %v2685_v4 = vpack.c.bf16 %v1987_v0, %v1986_v63 }
 0x1e7   : > { %2340 = vmatmul.mubr.msk.bf16.vlgmr.msra.gmra.mrb[12].mxu0 %vm515_vm2, %v3030_v55  ;;  %2359 = vmatprep.subr.bf16.mxu1 %v2884_v20 }
 0x1e8   : > { %2352 = vmatpush3.bf16.msra.mxu0 %v725_v6  ;;  %2355 = vmatprep.mubr.msk.bf16.mxu0 %vm2885_vm0, %v2884_v20  ;;  %v3213_v6 = vpop.permute.xlu0 %512 }
 0x1e9   : > { %2348 = vmatmul.mubr.msk.bf16.vlgmr.msra.gmra.mrb[12].mxu1 %vm515_vm2, %v3030_v55  ;;  %2353 = vmatprep.subr.bf16.mxu0 %v2884_v20 }
 0x1ea   : > { %2360 = vmatpush3.bf16.msra.mxu1 %v777_v8  ;;  %2363 = vmatprep.mubr.msk.bf16.mxu1 %vm2885_vm0, %v2884_v20 }
 0x1eb   : > { %2361 = vmatprep.subr.bf16.mxu1 %v2884_v20 }
 0x1ec   : > { %2354 = vmatpush3.bf16.msra.mxu0 %v728_v11 }
 0x1ed   : > { %2367 = vmatprep.subr.bf16.mxu0 %v2884_v20 }
 0x1ee   : > { %2362 = vmatpush3.bf16.msra.mxu1 %v780_v13 }
 0x1ef   : > { %2356 = vmatmul.mubr.msk.bf16.vlgmr.msra.gmra.mrb[16].mxu0 %vm515_vm2, %v3030_v55  ;;  %2375 = vmatprep.subr.bf16.mxu1 %v2884_v20 }
 0x1f0   : > { %2368 = vmatpush3.bf16.msra.mxu0 %v829_v14  ;;  %2371 = vmatprep.mubr.msk.bf16.mxu0 %vm2885_vm0, %v2884_v20 }
 0x1f1   : > { %2364 = vmatmul.mubr.msk.bf16.vlgmr.msra.gmra.mrb[16].mxu1 %vm515_vm2, %v3030_v55  ;;  %2369 = vmatprep.subr.bf16.mxu0 %v2884_v20 }
 0x1f2   : > { %2376 = vmatpush3.bf16.msra.mxu1 %v881_v16  ;;  %2379 = vmatprep.mubr.msk.bf16.mxu1 %vm2885_vm0, %v2884_v20 }
 0x1f3   : > { %2377 = vmatprep.subr.bf16.mxu1 %v2884_v20 }
 0x1f4   : > { %2370 = vmatpush3.bf16.msra.mxu0 %v832_v17 }
 0x1f5   : > { %2663 = vmatprep.subr.bf16.mxu0 %v2887_v26 }
 0x1f6   : > { %2378 = vmatpush3.bf16.msra.mxu1 %v884_v18 }
 0x1f7   : > { %2372 = vmatmul.mubr.msk.bf16.vlgmr.msra.gmra.mrb[20].mxu0 %vm515_vm2, %v3030_v55  ;;  %2687 = vmatprep.subr.bf16.mxu1 %v2887_v26 }
 0x1f8   : > { %2415 = vmatprep.mubr.msk.f32.mxu0 %vm2885_vm0, %v2884_v20  ;;  %2665 = vmatpush3.bf16.msra.mxu0 %v2664_v24 }
 0x1f9   : > { %2380 = vmatmul.mubr.msk.bf16.vlgmr.msra.gmra.mrb[20].mxu1 %vm515_vm2, %v3030_v55  ;;  %2666 = vmatprep.subr.bf16.mxu0 %v2887_v26  ;;  %v2679_v55 = vpack.c.bf16 %v1983_v53, %v1982_v52 }
 0x1fa   : > { %2450 = vmatprep.mubr.msk.f32.mxu1 %vm2885_vm0, %v2884_v20  ;;  %2689 = vmatpush3.bf16.msra.mxu1 %v2688_v27 }
 0x1fb   : > { %2690 = vmatprep.subr.bf16.mxu1 %v2887_v26 }
 0x1fc   : > { %2668 = vmatpush3.bf16.msra.mxu0 %v2667_v31 }
 0x1fd   : > { %2669 = vmatprep.subr.bf16.mxu0 %v2887_v26 }
 0x1fe   : > { %2692 = vmatpush3.bf16.msra.mxu1 %v2691_v33 }
 0x1ff   : > { %2693 = vmatprep.subr.bf16.mxu1 %v2887_v26 }
 0x200   : > { %2671 = vmatpush3.bf16.msra.mxu0 %v2670_v37 }
 0x201   : > { %2672 = vmatprep.subr.bf16.mxu0 %v2887_v26 }
 0x202   : > { %2695 = vmatpush3.bf16.msra.mxu1 %v2694_v39 }
 0x203   : > { %2696 = vmatprep.subr.bf16.mxu1 %v2887_v26 }
 0x204   : > { %2674 = vmatpush3.bf16.msra.mxu0 %v2673_v43 }
 0x205   : > { %2675 = vmatprep.subr.bf16.mxu0 %v2887_v26 }
 0x206   : > { %2698 = vmatpush3.bf16.msra.mxu1 %v2697_v45 }
 0x207   : > { %2699 = vmatprep.subr.bf16.mxu1 %v2887_v26 }
 0x208   : > { %2677 = vmatpush3.bf16.msra.mxu0 %v2676_v49 }
 0x209   : > { %2678 = vmatprep.subr.bf16.mxu0 %v2887_v26 }
 0x20a   : > { %2701 = vmatpush3.bf16.msra.mxu1 %v2700_v51 }
 0x20b   : > { %2702 = vmatprep.subr.bf16.mxu1 %v2887_v26 }
 0x20c   : > { %2680 = vmatpush3.bf16.msra.mxu0 %v2679_v55 }
 0x20d   : > { %2681 = vmatprep.subr.bf16.mxu0 %v2887_v26 }
 0x20e   : > { %2704 = vmatpush3.bf16.msra.mxu1 %v2703_v57 }
 0x20f   : > { %2705 = vmatprep.subr.bf16.mxu1 %v2887_v26 }
 0x210   : > { %2683 = vmatpush3.bf16.msra.mxu0 %v2682_v61 }
 0x211   : > { %2684 = vmatprep.subr.bf16.mxu0 %v2887_v26 }
 0x212   : > { %2707 = vmatpush3.bf16.msra.mxu1 %v2706_v1 }
 0x213   : > { %2708 = vmatprep.subr.bf16.mxu1 %v2887_v26 }
 0x214   : > { %2686 = vmatpush3.bf16.msra.mxu0 %v2685_v4 }
 0x215   : > { %2711 = vmatprep.subr.bf16.mxu0 %v2887_v26 }
 0x216   : > { %2710 = vmatpush3.bf16.msra.mxu1 %v2709_v5 }
 0x217   : > { %2735 = vmatprep.subr.bf16.mxu1 %v2887_v26 }
 0x2b2   : > { %v557_v7 = vpop.f32.mrb[8].mxu0 }
 0x2b3   : > { %v558_v8 = vadd.f32 %v557_v7, %v3213_v6  ;;  %v2325_v9 = vpop.f32.mrb[9].mxu0 }
 0x2b4   : > { %v608_v10 = vpop.f32.mrb[8].mxu1  ;;  %v560_v11 = vpop.f32.mrb[10].mxu0 }
 0x2b5   : > { %v563_v12 = vmax.f32 %v558_v8, 0.0  ;;  %v609_v13 = vadd.f32 %v608_v10, %v3213_v6  ;;  %v2333_v14 = vpop.f32.mrb[9].mxu1  ;;  %v2326_v15 = vpop.f32.mrb[11].mxu0 }
 0x2b6   : > { %v611_v16 = vpop.f32.mrb[10].mxu1 }
 0x2b7   : > { %564 = vst [vmem:[#allocation3] sm:$0xff] %v563_v12  ;;  %v614_v19 = vmax.f32 %v609_v13, 0.0  ;;  %v2334_v17 = vpop.f32.mrb[11].mxu1 }
 0x2b9   : > { %616 = vst [vmem:[#allocation3 + $0x8] sm:$0xff] %v614_v19 }
 0x2ba   : > { %v660_v18 = vpop.f32.mrb[12].mxu0 }
 0x2bb   : > { %v661_v21 = vadd.f32 %v660_v18, %v3213_v6  ;;  %v2341_v22 = vpop.f32.mrb[13].mxu0 }
 0x2bc   : > { %v712_v23 = vpop.f32.mrb[12].mxu1  ;;  %v663_v24 = vpop.f32.mrb[14].mxu0 }
 0x2bd   : > { %v666_v25 = vmax.f32 %v661_v21, 0.0  ;;  %v713_v27 = vadd.f32 %v712_v23, %v3213_v6  ;;  %v2349_v28 = vpop.f32.mrb[13].mxu1  ;;  %v2342_v29 = vpop.f32.mrb[15].mxu0 }
 0x2be   : > { %v715_v30 = vpop.f32.mrb[14].mxu1  ;;  %v953_v56 = vld [vmem:[#allocation3 + $0x1] sm:$0x1]  ;;  %v1409_v60 = vld [vmem:[#allocation3 + $0x4] sm:$0x1] }
 0x2bf   : > { %668 = vst [vmem:[#allocation3 + $0x10] sm:$0xff] %v666_v25  ;;  %v718_v31 = vmax.f32 %v713_v27, 0.0  ;;  %v2350_v32 = vpop.f32.mrb[15].mxu1  ;;  %v929_v63 = vld [vmem:[#allocation3] sm:$0x1] }
 0x2c0   : > { %v954_v38 = vld [vmem:[#allocation3 + $0x9] sm:$0x1]  ;;  %v930_v43 = vld [vmem:[#allocation3 + $0x8] sm:$0x1]  ;;  %v1410_v45 = vld [vmem:[#allocation3 + $0xc] sm:$0x1] }
 0x2c1   : > { %720 = vst [vmem:[#allocation3 + $0x18] sm:$0xff] %v718_v31  ;;  %v1529_v46 = vld [vmem:[#allocation3 + $0xd] sm:$0x1]  ;;  %v986_v51 = vrot.slane %v954_v38, 7  ;;  %v1086_v52 = vrot.slane %v930_v43, 7  ;;  %v1442_v53 = vrot.slane %v1410_v45, 7 }
 0x2c2   : > { %v764_v33 = vpop.f32.mrb[16].mxu0  ;;  %v1561_v54 = vrot.slane %v1529_v46, 7  ;;  %v1528_v15 = vld [vmem:[#allocation3 + $0x5] sm:$0x1]  ;;  %v3240_v38 = vld [vmem:[%s3679_s4 + $0x108] sm:$0xff] }
 0x2c3   : > { %v765_v34 = vadd.f32 %v764_v33, %v3213_v6  ;;  %v2357_v35 = vpop.f32.mrb[17].mxu0  ;;  %v988_v13 = vsel %vm987_vm3, %v986_v51, %v953_v56  ;;  %v1443_v14 = vsel %vm987_vm3, %v1442_v53, %v1409_v60  ;;  %v1087_v18 = vsel %vm987_vm3, %v1086_v52, %v929_v63 }
 0x2c4   : > { %v816_v36 = vpop.f32.mrb[16].mxu1  ;;  %v767_v37 = vpop.f32.mrb[18].mxu0  ;;  %v1562_v22 = vsel %vm987_vm3, %v1561_v54, %v1528_v15  ;;  %v3255_v54 = vld [vmem:[%s3679_s4 + $0x110] sm:$0xff] }
 0x2c5   : > { %v770_v39 = vmax.f32 %v765_v34, 0.0  ;;  %v817_v40 = vadd.f32 %v816_v36, %v3213_v6  ;;  %v2365_v41 = vpop.f32.mrb[17].mxu1  ;;  %v2358_v42 = vpop.f32.mrb[19].mxu0  ;;  %v3235_v37 = vld [vmem:[%s3679_s4 + $0x100] sm:$0xff] }
 0x2c6   : > { %v819_v44 = vpop.f32.mrb[18].mxu1  ;;  %v955_v49 = vld [vmem:[#allocation3 + $0x11] sm:$0x1]  ;;  %v931_v50 = vld [vmem:[#allocation3 + $0x10] sm:$0x1] }
 0x2c7   : > { %772 = vst [vmem:[#allocation3 + $0x20] sm:$0xff] %v770_v39  ;;  %v822_v47 = vmax.f32 %v817_v40, 0.0  ;;  %v2366_v48 = vpop.f32.mrb[19].mxu1  ;;  %v989_v58 = vrot.slane %v955_v49, 6  ;;  %v1088_v0 = vrot.slane %v931_v50, 6  ;;  %v2005_v49 = vld [vmem:[%s3679_s4 + $0x188] sm:$0xff] }
 0x2c8   : > { %v956_v57 = vld [vmem:[#allocation3 + $0x19] sm:$0x1]  ;;  %v932_v59 = vld [vmem:[#allocation3 + $0x18] sm:$0x1]  ;;  %v1411_v1 = vld [vmem:[#allocation3 + $0x14] sm:$0x1] }
 0x2c9   : > { %824 = vst [vmem:[#allocation3 + $0x28] sm:$0xff] %v822_v47  ;;  %v1412_v2 = vld [vmem:[#allocation3 + $0x1c] sm:$0x1]  ;;  %v1444_v5 = vrot.slane %v1411_v1, 6  ;;  %v1530_v8 = vld [vmem:[#allocation3 + $0x15] sm:$0x1]  ;;  %v991_v29 = vsel %vm990_vm4, %v989_v58, %v988_v13  ;;  %v1089_v30 = vsel %vm990_vm4, %v1088_v0, %v1087_v18 }
 0x2ca   : > { %v868_v55 = vpop.f32.mrb[20].mxu0  ;;  %v1446_v7 = vrot.slane %v1412_v2, 5  ;;  %v1563_v23 = vrot.slane %v1530_v8, 6  ;;  %v992_v25 = vrot.slane %v956_v57, 5  ;;  %v1090_v27 = vrot.slane %v932_v59, 5  ;;  %v2004_v48 = vld [vmem:[%s3679_s4 + $0x180] sm:$0xff] }
 0x2cb   : > { %v869_v61 = vadd.f32 %v868_v55, %v3213_v6  ;;  %v2373_v62 = vpop.f32.mrb[21].mxu0  ;;  %v1445_v21 = vsel %vm990_vm4, %v1444_v5, %v1443_v14  ;;  %v1531_v31 = vld [vmem:[#allocation3 + $0x1d] sm:$0x1]  ;;  %v1648_v58 = vld [vmem:[#allocation3 + $0xe] sm:$0x1]  ;;  %v2712_v2 = vpack.c.bf16 %v3240_v38, %v3235_v37 }
 0x2cc   : > { %v920_v3 = vpop.f32.mrb[20].mxu1  ;;  %v871_v4 = vpop.f32.mrb[22].mxu0  ;;  %v1447_v28 = vsel %vm993_vm5, %v1446_v7, %v1445_v21  ;;  %v1564_v32 = vsel %vm990_vm4, %v1563_v23, %v1562_v22  ;;  %v994_v40 = vsel %vm993_vm5, %v992_v25, %v991_v29  ;;  %v1091_v41 = vsel %vm993_vm5, %v1090_v27, %v1089_v30  ;;  %v3276_v5 = vld [vmem:[%s3679_s4 + $0x198] sm:$0xff]  ;;  %v3281_v7 = vld [vmem:[%s3679_s4 + $0x120] sm:$0xff]  ;;  %v3286_v8 = vld [vmem:[%s3679_s4 + $0x128] sm:$0xff] }
 0x2cd   : > { %v874_v9 = vmax.f32 %v869_v61, 0.0  ;;  %v921_v10 = vadd.f32 %v920_v3, %v3213_v6  ;;  %v2381_v11 = vpop.f32.mrb[21].mxu1  ;;  %v2374_v12 = vpop.f32.mrb[23].mxu0  ;;  %v1565_v45 = vrot.slane %v1531_v31, 5  ;;  %v3262_v61 = vld [vmem:[%s3679_s4 + $0x118] sm:$0xff]  ;;  %v2736_v3 = vpack.c.bf16 %v2005_v49, %v2004_v48  ;;  %v3271_v4 = vld [vmem:[%s3679_s4 + $0x190] sm:$0xff] }
 0x2ce   : > { %v923_v16 = vpop.f32.mrb[22].mxu1  ;;  %v957_v19 = vld [vmem:[#allocation3 + $0x21] sm:$0x1]  ;;  %v933_v17 = vld [vmem:[#allocation3 + $0x20] sm:$0x1]  ;;  %v1680_v14 = vrot.slane %v1648_v58, 7  ;;  %v2715_v22 = vpack.c.bf16 %v3262_v61, %v3255_v54 }
 0x2cf   : > { %876 = vst [vmem:[#allocation3 + $0x30] sm:$0xff] %v874_v9  ;;  %v926_v24 = vmax.f32 %v921_v10, 0.0  ;;  %v2382_v6 = vpop.f32.mrb[23].mxu1  ;;  %v995_v34 = vrot.slane %v957_v19, 4  ;;  %v1092_v36 = vrot.slane %v933_v17, 4  ;;  %v1566_v57 = vsel %vm993_vm5, %v1565_v45, %v1564_v32  ;;  %v3299_v29 = vld [vmem:[%s3679_s4 + $0x1a0] sm:$0xff] }
 0x2d0   : > { %v958_v33 = vld [vmem:[#allocation3 + $0x29] sm:$0x1]  ;;  %v934_v35 = vld [vmem:[#allocation3 + $0x28] sm:$0x1]  ;;  %v1413_v39 = vld [vmem:[#allocation3 + $0x24] sm:$0x1] }
 0x2d1   : > { %928 = vst [vmem:[#allocation3 + $0x38] sm:$0xff] %v926_v24  ;;  %v1414_v42 = vld [vmem:[#allocation3 + $0x2c] sm:$0x1]  ;;  %v1448_v43 = vrot.slane %v1413_v39, 4  ;;  %v1532_v44 = vld [vmem:[#allocation3 + $0x25] sm:$0x1]  ;;  %v997_v52 = vsel %vm996_vm6, %v995_v34, %v994_v40  ;;  %v1093_v53 = vsel %vm996_vm6, %v1092_v36, %v1091_v41  ;;  %v2739_v34 = vpack.c.bf16 %v3276_v5, %v3271_v4 }
 0x2d2   : > { %v998_v46 = vrot.slane %v958_v33, 3  ;;  %v1094_v47 = vrot.slane %v934_v35, 3  ;;  %v1450_v50 = vrot.slane %v1414_v42, 3  ;;  %v1567_v51 = vrot.slane %v1532_v44, 4  ;;  %v1533_v56 = vld [vmem:[#allocation3 + $0x2d] sm:$0x1] }
 0x2d3   : > { %v1449_v55 = vsel %vm996_vm6, %v1448_v43, %v1447_v28  ;;  %v1569_v13 = vrot.slane %v1533_v56, 3  ;;  %v1649_v21 = vld [vmem:[#allocation3 + $0x16] sm:$0x1]  ;;  %v1647_v24 = vld [vmem:[#allocation3 + $0x6] sm:$0x1]  ;;  %v2718_v35 = vpack.c.bf16 %v3286_v8, %v3281_v7  ;;  %v2009_v36 = vld [vmem:[%s3679_s4 + $0x1a8] sm:$0xff] }
 0x2d4   : > { %v1451_v62 = vsel %vm999_vm7, %v1450_v50, %v1449_v55  ;;  %v1568_v63 = vsel %vm996_vm6, %v1567_v51, %v1566_v57  ;;  %v1000_v10 = vsel %vm999_vm7, %v998_v46, %v997_v52  ;;  %v1095_v12 = vsel %vm999_vm7, %v1094_v47, %v1093_v53  ;;  %v1650_v6 = vld [vmem:[#allocation3 + $0x1e] sm:$0x1]  ;;  %v1651_v25 = vld [vmem:[#allocation3 + $0x26] sm:$0x1]  ;;  %v1652_v39 = vld [vmem:[#allocation3 + $0x2e] sm:$0x1] }
 0x2d5   : > { %v1570_v37 = vsel %vm999_vm7, %v1569_v13, %v1568_v63  ;;  %v1681_v44 = vsel %vm987_vm3, %v1680_v14, %v1647_v24  ;;  %v1682_v45 = vrot.slane %v1649_v21, 6  ;;  %v1767_v46 = vld [vmem:[#allocation3 + $0xf] sm:$0x1]  ;;  %v1684_v49 = vrot.slane %v1650_v6, 5  ;;  %v1768_v51 = vld [vmem:[#allocation3 + $0x17] sm:$0x1] }
 0x2d6   : > { %v959_v59 = vld [vmem:[#allocation3 + $0x31] sm:$0x1]  ;;  %v935_v60 = vld [vmem:[#allocation3 + $0x30] sm:$0x1]  ;;  %v1415_v18 = vld [vmem:[#allocation3 + $0x34] sm:$0x1] }
 0x2d7   : > { %v1001_v0 = vrot.slane %v959_v59, 2  ;;  %v1096_v1 = vrot.slane %v935_v60, 2  ;;  %v1452_v30 = vrot.slane %v1415_v18, 2  ;;  %v1534_v32 = vld [vmem:[#allocation3 + $0x35] sm:$0x1]  ;;  %v1686_v50 = vrot.slane %v1651_v25, 4 }
 0x2d8   : > { %v960_v9 = vld [vmem:[#allocation3 + $0x39] sm:$0x1]  ;;  %v936_v11 = vld [vmem:[#allocation3 + $0x38] sm:$0x1]  ;;  %v1416_v23 = vld [vmem:[#allocation3 + $0x3c] sm:$0x1]  ;;  %v1683_v54 = vsel %vm990_vm4, %v1682_v45, %v1681_v44  ;;  %v2742_v59 = vpack.c.bf16 %v2009_v36, %v3299_v29 }
 0x2d9   : > { %v1003_v15 = vsel %vm1002_vm8, %v1001_v0, %v1000_v10  ;;  %v1004_v16 = vrot.slane %v960_v9, 1  ;;  %v1097_v19 = vsel %vm1002_vm8, %v1096_v1, %v1095_v12  ;;  %v1098_v17 = vrot.slane %v936_v11, 1  ;;  %v1535_v33 = vld [vmem:[#allocation3 + $0x3d] sm:$0x1]  ;;  %v1653_v40 = vld [vmem:[#allocation3 + $0x36] sm:$0x1] }
 0x2da   : > { %v1454_v31 = vrot.slane %v1416_v23, 1  ;;  %v1571_v38 = vrot.slane %v1534_v32, 2  ;;  %v1453_v41 = vsel %vm1002_vm8, %v1452_v30, %v1451_v62  ;;  %v1573_v42 = vrot.slane %v1535_v33, 1  ;;  %v1654_v43 = vld [vmem:[#allocation3 + $0x3e] sm:$0x1]  ;;  %v1994_v1 = vld [vmem:[%s3679_s4 + $0x130] sm:$0xff] }
 0x2db   : > { %v1006_v27 = vsel %vm1005_vm9, %v1004_v16, %v1003_v15  ;;  %v1099_v28 = vsel %vm1005_vm9, %v1098_v17, %v1097_v19  ;;  %v1769_v52 = vld [vmem:[#allocation3 + $0x1f] sm:$0x1]  ;;  %v1688_v55 = vrot.slane %v1652_v39, 3  ;;  %v1690_v56 = vrot.slane %v1653_v40, 2  ;;  %v1770_v57 = vld [vmem:[#allocation3 + $0x27] sm:$0x1] }
 0x2dc   : > { %2416 = vmatmul.mubr.f32.vlgmr.msra.gmra.mrb[24].mxu0 %v1006_v27  ;;  %2451 = vmatmul.mubr.f32.vlgmr.msra.gmra.mrb[24].mxu1 %v1099_v28  ;;  %v3314_v47 = vsel %vm1005_vm9, %v1454_v31, %v1453_v41  ;;  %v1572_v48 = vsel %vm1002_vm8, %v1571_v38, %v1570_v37  ;;  %v1771_v58 = vld [vmem:[#allocation3 + $0x2f] sm:$0x1]  ;;  %v1685_v60 = vsel %vm993_vm5, %v1684_v49, %v1683_v54  ;;  %v1692_v61 = vrot.slane %v1654_v43, 1  ;;  %v1766_v62 = vld [vmem:[#allocation3 + $0x7] sm:$0x1]  ;;  %v1995_v8 = vld [vmem:[%s3679_s4 + $0x138] sm:$0xff] }
 0x2dd   : > { %2713 = vmatpush3.bf16.msra.mxu0 %v2712_v2  ;;  %2737 = vmatpush3.bf16.msra.mxu1 %v2736_v3  ;;  %v3322_v53 = vsel %vm1005_vm9, %v1573_v42, %v1572_v48  ;;  %v1772_v63 = vld [vmem:[#allocation3 + $0x37] sm:$0x1]  ;;  %v1799_v0 = vrot.slane %v1767_v46, 7  ;;  %v1687_v2 = vsel %vm996_vm6, %v1686_v50, %v1685_v60  ;;  %v1773_v3 = vld [vmem:[#allocation3 + $0x3f] sm:$0x1]  ;;  %v1801_v4 = vrot.slane %v1768_v51, 6 }
 0x2de   : > { %2714 = vmatprep.subr.bf16.mxu0 %v2887_v26  ;;  %2738 = vmatprep.subr.bf16.mxu1 %v2887_v26  ;;  %v1803_v5 = vrot.slane %v1769_v52, 5  ;;  %v1805_v7 = vrot.slane %v1770_v57, 4  ;;  %v2010_v9 = vld [vmem:[%s3679_s4 + $0x1b0] sm:$0xff]  ;;  %v2011_v10 = vld [vmem:[%s3679_s4 + $0x1b8] sm:$0xff]  ;;  %v1689_v11 = vsel %vm999_vm7, %v1688_v55, %v1687_v2  ;;  %v1807_v13 = vrot.slane %v1771_v58, 3  ;;  %v1996_v23 = vld [vmem:[%s3679_s4 + $0x140] sm:$0xff] }
 0x2df   : > { %2485 = vmatprep.mubr.msk.f32.mxu0 %vm2885_vm0, %v2884_v20  ;;  %2520 = vmatprep.mubr.msk.f32.mxu1 %vm2885_vm0, %v2884_v20  ;;  %v1800_v12 = vsel %vm987_vm3, %v1799_v0, %v1766_v62  ;;  %v1691_v14 = vsel %vm1002_vm8, %v1690_v56, %v1689_v11  ;;  %v1809_v16 = vrot.slane %v1772_v63, 2  ;;  %v1811_v18 = vrot.slane %v1773_v3, 1  ;;  %v1997_v6 = vld [vmem:[%s3679_s4 + $0x148] sm:$0xff]  ;;  %v2012_v25 = vld [vmem:[%s3679_s4 + $0x1c0] sm:$0xff]  ;;  %v1173_v36 = vld [vmem:[#allocation3 + $0x12] sm:$0x1] }
 0x2e0   : > { %v1802_v15 = vsel %vm990_vm4, %v1801_v4, %v1800_v12  ;;  %v3347_v19 = vsel %vm1005_vm9, %v1692_v61, %v1691_v14  ;;  %v2721_v21 = vpack.c.bf16 %v1995_v8, %v1994_v1  ;;  %v2013_v27 = vld [vmem:[%s3679_s4 + $0x1c8] sm:$0xff]  ;;  %v2724_v33 = vpack.c.bf16 %v1997_v6, %v1996_v23  ;;  %v1292_v37 = vld [vmem:[#allocation3 + $0x13] sm:$0x1]  ;;  %v1999_v38 = vld [vmem:[%s3679_s4 + $0x158] sm:$0xff] }
 0x2e1   : > { %2716 = vmatpush3.bf16.msra.mxu0 %v2715_v22  ;;  %2740 = vmatpush3.bf16.msra.mxu1 %v2739_v34  ;;  %v1804_v17 = vsel %vm993_vm5, %v1803_v5, %v1802_v15  ;;  %v2745_v22 = vpack.c.bf16 %v2011_v10, %v2010_v9  ;;  %v1172_v30 = vld [vmem:[#allocation3 + $0xa] sm:$0x1]  ;;  %v1291_v31 = vld [vmem:[#allocation3 + $0xb] sm:$0x1]  ;;  %v2748_v34 = vpack.c.bf16 %v2013_v27, %v2012_v25  ;;  %v2014_v39 = vld [vmem:[%s3679_s4 + $0x1d0] sm:$0xff]  ;;  %v1206_v46 = vrot.slane %v1173_v36, 6 }
 0x2e2   : > { %2717 = vmatprep.subr.bf16.mxu0 %v2887_v26  ;;  %2741 = vmatprep.subr.bf16.mxu1 %v2887_v26  ;;  %v1806_v24 = vsel %vm996_vm6, %v1805_v7, %v1804_v17  ;;  %v2015_v40 = vld [vmem:[%s3679_s4 + $0x1d8] sm:$0xff]  ;;  %v1204_v41 = vrot.slane %v1172_v30, 7  ;;  %v1323_v42 = vrot.slane %v1291_v31, 7  ;;  %v2000_v43 = vld [vmem:[%s3679_s4 + $0x160] sm:$0xff]  ;;  %v2001_v44 = vld [vmem:[%s3679_s4 + $0x168] sm:$0xff]  ;;  %v1325_v49 = vrot.slane %v1292_v37, 6 }
 0x2e3   : > { %v1808_v28 = vsel %vm999_vm7, %v1807_v13, %v1806_v24  ;;  %v1174_v45 = vld [vmem:[#allocation3 + $0x1a] sm:$0x1]  ;;  %v1293_v48 = vld [vmem:[#allocation3 + $0x1b] sm:$0x1]  ;;  %v2751_v51 = vpack.c.bf16 %v2015_v40, %v2014_v39  ;;  %v2016_v52 = vld [vmem:[%s3679_s4 + $0x1e0] sm:$0xff]  ;;  %v2730_v5 = vpack.c.bf16 %v2001_v44, %v2000_v43 }
 0x2e4   : > { %v1810_v29 = vsel %vm1002_vm8, %v1809_v16, %v1808_v28  ;;  %v1175_v54 = vld [vmem:[#allocation3 + $0x22] sm:$0x1]  ;;  %v1294_v55 = vld [vmem:[#allocation3 + $0x23] sm:$0x1]  ;;  %v2017_v56 = vld [vmem:[%s3679_s4 + $0x1e8] sm:$0xff]  ;;  %v1208_v60 = vrot.slane %v1174_v45, 5 }
 0x2e5   : > { %2719 = vmatpush3.bf16.msra.mxu0 %v2718_v35  ;;  %2743 = vmatpush3.bf16.msra.mxu1 %v2742_v59  ;;  %v3368_v32 = vsel %vm1005_vm9, %v1811_v18, %v1810_v29  ;;  %v1998_v35 = vld [vmem:[%s3679_s4 + $0x150] sm:$0xff]  ;;  %v1171_v57 = vld [vmem:[#allocation3 + $0x2] sm:$0x1]  ;;  %v1290_v58 = vld [vmem:[#allocation3 + $0x3] sm:$0x1]  ;;  %v1327_v62 = vrot.slane %v1293_v48, 5  ;;  %v2754_v7 = vpack.c.bf16 %v2017_v56, %v2016_v52 }
 0x2e6   : > { %2720 = vmatprep.subr.bf16.mxu0 %v2887_v26  ;;  %2744 = vmatprep.subr.bf16.mxu1 %v2887_v26  ;;  %v2727_v50 = vpack.c.bf16 %v1999_v38, %v1998_v35  ;;  %v1205_v59 = vsel %vm987_vm3, %v1204_v41, %v1171_v57  ;;  %v1324_v61 = vsel %vm987_vm3, %v1323_v42, %v1290_v58  ;;  %v1176_v63 = vld [vmem:[#allocation3 + $0x2a] sm:$0x1]  ;;  %v1210_v1 = vrot.slane %v1175_v54, 4  ;;  %v1295_v2 = vld [vmem:[#allocation3 + $0x2b] sm:$0x1]  ;;  %v2002_v8 = vld [vmem:[%s3679_s4 + $0x170] sm:$0xff] }
 0x2e7   : > { %v1207_v0 = vsel %vm990_vm4, %v1206_v46, %v1205_v59  ;;  %v1326_v3 = vsel %vm990_vm4, %v1325_v49, %v1324_v61  ;;  %v1329_v4 = vrot.slane %v1294_v55, 4  ;;  %v1177_v9 = vld [vmem:[#allocation3 + $0x32] sm:$0x1]  ;;  %v1296_v10 = vld [vmem:[#allocation3 + $0x33] sm:$0x1]  ;;  %v2003_v11 = vld [vmem:[%s3679_s4 + $0x178] sm:$0xff] }
 0x2e8   : > { %v2018_v12 = vld [vmem:[%s3679_s4 + $0x1f0] sm:$0xff]  ;;  %v2019_v13 = vld [vmem:[%s3679_s4 + $0x1f8] sm:$0xff]  ;;  %v1209_v14 = vsel %vm993_vm5, %v1208_v60, %v1207_v0  ;;  %v1212_v15 = vrot.slane %v1176_v63, 3  ;;  %v1328_v16 = vsel %vm993_vm5, %v1327_v62, %v1326_v3  ;;  %v1331_v17 = vrot.slane %v1295_v2, 3  ;;  %v2020_v28 = vld [vmem:[%s3679_s4 + $0x200] sm:$0xff] }
 0x2e9   : > { %2722 = vmatpush3.bf16.msra.mxu0 %v2721_v21  ;;  %2746 = vmatpush3.bf16.msra.mxu1 %v2745_v22  ;;  %v1178_v18 = vld [vmem:[#allocation3 + $0x3a] sm:$0x1]  ;;  %v1211_v21 = vsel %vm996_vm6, %v1210_v1, %v1209_v14  ;;  %v1214_v22 = vrot.slane %v1177_v9, 2  ;;  %v1297_v23 = vld [vmem:[#allocation3 + $0x3b] sm:$0x1]  ;;  %v1330_v24 = vsel %vm996_vm6, %v1329_v4, %v1328_v16  ;;  %v1333_v6 = vrot.slane %v1296_v10, 2 }
 0x2ea   : > { %2723 = vmatprep.subr.bf16.mxu0 %v2887_v26  ;;  %2747 = vmatprep.subr.bf16.mxu1 %v2887_v26  ;;  %v2733_v25 = vpack.c.bf16 %v2003_v11, %v2002_v8  ;;  %v2757_v27 = vpack.c.bf16 %v2019_v13, %v2018_v12  ;;  %v2021_v29 = vld [vmem:[%s3679_s4 + $0x208] sm:$0xff]  ;;  %v2036_v30 = vld [vmem:[%s3679_s4 + $0x280] sm:$0xff]  ;;  %v1332_v35 = vsel %vm999_vm7, %v1331_v17, %v1330_v24  ;;  %v1335_v36 = vrot.slane %v1297_v23, 1  ;;  %v2022_v41 = vld [vmem:[%s3679_s4 + $0x210] sm:$0xff] }
 0x2eb   : > { %v2037_v31 = vld [vmem:[%s3679_s4 + $0x288] sm:$0xff]  ;;  %v1334_v38 = vsel %vm1002_vm8, %v1333_v6, %v1332_v35  ;;  %v2760_v39 = vpack.c.bf16 %v2021_v29, %v2020_v28  ;;  %v2023_v42 = vld [vmem:[%s3679_s4 + $0x218] sm:$0xff]  ;;  %v2038_v43 = vld [vmem:[%s3679_s4 + $0x290] sm:$0xff] }
 0x2ec   : > { %v2784_v40 = vpack.c.bf16 %v2037_v31, %v2036_v30  ;;  %v2039_v44 = vld [vmem:[%s3679_s4 + $0x298] sm:$0xff]  ;;  %v1336_v46 = vsel %vm1005_vm9, %v1335_v36, %v1334_v38  ;;  %v2763_v48 = vpack.c.bf16 %v2023_v42, %v2022_v41  ;;  %v2040_v52 = vld [vmem:[%s3679_s4 + $0x2a0] sm:$0xff]  ;;  %v2041_v54 = vld [vmem:[%s3679_s4 + $0x2a8] sm:$0xff] }
 0x2ed   : > { %2725 = vmatpush3.bf16.msra.mxu0 %v2724_v33  ;;  %2749 = vmatpush3.bf16.msra.mxu1 %v2748_v34  ;;  %v1213_v33 = vsel %vm999_vm7, %v1212_v15, %v1211_v21  ;;  %v1216_v34 = vrot.slane %v1178_v18, 1  ;;  %v2787_v49 = vpack.c.bf16 %v2039_v44, %v2038_v43  ;;  %v2790_v56 = vpack.c.bf16 %v2041_v54, %v2040_v52  ;;  %v2026_v57 = vld [vmem:[%s3679_s4 + $0x230] sm:$0xff]  ;;  %v2027_v58 = vld [vmem:[%s3679_s4 + $0x238] sm:$0xff]  ;;  %v2028_v63 = vld [vmem:[%s3679_s4 + $0x240] sm:$0xff] }
 0x2ee   : > { %2726 = vmatprep.subr.bf16.mxu0 %v2887_v26  ;;  %2750 = vmatprep.subr.bf16.mxu1 %v2887_v26  ;;  %v1215_v37 = vsel %vm1002_vm8, %v1214_v22, %v1213_v33  ;;  %v2042_v59 = vld [vmem:[%s3679_s4 + $0x2b0] sm:$0xff]  ;;  %v2043_v60 = vld [vmem:[%s3679_s4 + $0x2b8] sm:$0xff]  ;;  %v2769_v61 = vpack.c.bf16 %v2027_v58, %v2026_v57  ;;  %v2029_v0 = vld [vmem:[%s3679_s4 + $0x248] sm:$0xff] }
 0x2ef   : > { %v1217_v45 = vsel %vm1005_vm9, %v1216_v34, %v1215_v37  ;;  %v2793_v62 = vpack.c.bf16 %v2043_v60, %v2042_v59  ;;  %v2044_v1 = vld [vmem:[%s3679_s4 + $0x2c0] sm:$0xff]  ;;  %v2045_v2 = vld [vmem:[%s3679_s4 + $0x2c8] sm:$0xff]  ;;  %v2772_v3 = vpack.c.bf16 %v2029_v0, %v2028_v63  ;;  %v2046_v8 = vld [vmem:[%s3679_s4 + $0x2d0] sm:$0xff] }
 0x2f0   : > { %v2796_v4 = vpack.c.bf16 %v2045_v2, %v2044_v1  ;;  %v2047_v9 = vld [vmem:[%s3679_s4 + $0x2d8] sm:$0xff]  ;;  %v2032_v12 = vld [vmem:[%s3679_s4 + $0x260] sm:$0xff]  ;;  %v2033_v13 = vld [vmem:[%s3679_s4 + $0x268] sm:$0xff] }
 0x2f1   : > { %2728 = vmatpush3.bf16.msra.mxu0 %v2727_v50  ;;  %2752 = vmatpush3.bf16.msra.mxu1 %v2751_v51  ;;  %v2024_v50 = vld [vmem:[%s3679_s4 + $0x220] sm:$0xff]  ;;  %v2025_v51 = vld [vmem:[%s3679_s4 + $0x228] sm:$0xff]  ;;  %v2799_v11 = vpack.c.bf16 %v2047_v9, %v2046_v8  ;;  %v2778_v16 = vpack.c.bf16 %v2033_v13, %v2032_v12  ;;  %v2034_v18 = vld [vmem:[%s3679_s4 + $0x270] sm:$0xff] }
 0x2f2   : > { %2729 = vmatprep.subr.bf16.mxu0 %v2887_v26  ;;  %2753 = vmatprep.subr.bf16.mxu1 %v2887_v26  ;;  %v2766_v55 = vpack.c.bf16 %v2025_v51, %v2024_v50  ;;  %v2048_v14 = vld [vmem:[%s3679_s4 + $0x2e0] sm:$0xff]  ;;  %v2049_v15 = vld [vmem:[%s3679_s4 + $0x2e8] sm:$0xff]  ;;  %v2035_v21 = vld [vmem:[%s3679_s4 + $0x278] sm:$0xff] }
 0x2f3   : > { %v2802_v17 = vpack.c.bf16 %v2049_v15, %v2048_v14  ;;  %v2050_v22 = vld [vmem:[%s3679_s4 + $0x2f0] sm:$0xff]  ;;  %v2051_v23 = vld [vmem:[%s3679_s4 + $0x2f8] sm:$0xff]  ;;  %v2781_v24 = vpack.c.bf16 %v2035_v21, %v2034_v18  ;;  %v2068_v28 = vld [vmem:[%s3679_s4 + $0x380] sm:$0xff] }
 0x2f4   : > { %v2805_v6 = vpack.c.bf16 %v2051_v23, %v2050_v22  ;;  %v2069_v29 = vld [vmem:[%s3679_s4 + $0x388] sm:$0xff]  ;;  %v2054_v33 = vld [vmem:[%s3679_s4 + $0x310] sm:$0xff]  ;;  %v2055_v34 = vld [vmem:[%s3679_s4 + $0x318] sm:$0xff] }
 0x2f5   : > { %2731 = vmatpush3.bf16.msra.mxu0 %v2730_v5  ;;  %2755 = vmatpush3.bf16.msra.mxu1 %v2754_v7  ;;  %v2030_v5 = vld [vmem:[%s3679_s4 + $0x250] sm:$0xff]  ;;  %v2031_v7 = vld [vmem:[%s3679_s4 + $0x258] sm:$0xff]  ;;  %v2832_v31 = vpack.c.bf16 %v2069_v29, %v2068_v28  ;;  %v2811_v37 = vpack.c.bf16 %v2055_v34, %v2054_v33  ;;  %v2061_v50 = vld [vmem:[%s3679_s4 + $0x348] sm:$0xff] }
 0x2f6   : > { %2732 = vmatprep.subr.bf16.mxu0 %v2887_v26  ;;  %2756 = vmatprep.subr.bf16.mxu1 %v2887_v26  ;;  %v2775_v10 = vpack.c.bf16 %v2031_v7, %v2030_v5  ;;  %v2070_v35 = vld [vmem:[%s3679_s4 + $0x390] sm:$0xff]  ;;  %v2071_v36 = vld [vmem:[%s3679_s4 + $0x398] sm:$0xff]  ;;  %v2076_v51 = vld [vmem:[%s3679_s4 + $0x3c0] sm:$0xff] }
 0x2f7   : > { %v2835_v38 = vpack.c.bf16 %v2071_v36, %v2070_v35  ;;  %v2058_v43 = vld [vmem:[%s3679_s4 + $0x330] sm:$0xff]  ;;  %v2059_v44 = vld [vmem:[%s3679_s4 + $0x338] sm:$0xff]  ;;  %v2077_v52 = vld [vmem:[%s3679_s4 + $0x3c8] sm:$0xff] }
 0x2f8   : > { %v2063_v57 = vld [vmem:[%s3679_s4 + $0x358] sm:$0xff]  ;;  %v2078_v58 = vld [vmem:[%s3679_s4 + $0x3d0] sm:$0xff]  ;;  %v2065_v63 = vld [vmem:[%s3679_s4 + $0x368] sm:$0xff] }
 0x2f9   : > { %2734 = vmatpush3.bf16.msra.mxu0 %v2733_v25  ;;  %2758 = vmatpush3.bf16.msra.mxu1 %v2757_v27  ;;  %v2052_v25 = vld [vmem:[%s3679_s4 + $0x300] sm:$0xff]  ;;  %v2053_v27 = vld [vmem:[%s3679_s4 + $0x308] sm:$0xff]  ;;  %v2079_v59 = vld [vmem:[%s3679_s4 + $0x3d8] sm:$0xff] }
 0x2fa   : > { %2759 = vmatprep.subr.bf16.mxu0 %v2887_v26  ;;  %2783 = vmatprep.subr.bf16.mxu1 %v2887_v26  ;;  %v2808_v30 = vpack.c.bf16 %v2053_v27, %v2052_v25  ;;  %v2080_v0 = vld [vmem:[%s3679_s4 + $0x3e0] sm:$0xff]  ;;  %v2081_v1 = vld [vmem:[%s3679_s4 + $0x3e8] sm:$0xff]  ;;  %v2067_v5 = vld [vmem:[%s3679_s4 + $0x378] sm:$0xff] }
 0x2fb   : > { %v2082_v7 = vld [vmem:[%s3679_s4 + $0x3f0] sm:$0xff]  ;;  %v2083_v8 = vld [vmem:[%s3679_s4 + $0x3f8] sm:$0xff]  ;;  %v2084_v33 = vld [vmem:[%s3680_s5] ss:$0 sm:$0xff] }
 0x2fc   : > { %2486 = vmatmul.mubr.f32.vlgmr.msra.gmra.mrb[26].mxu0 %v1217_v45  ;;  %2521 = vmatmul.mubr.f32.vlgmr.msra.gmra.mrb[26].mxu1 %v1336_v46  ;;  %v2075_v45 = vld [vmem:[%s3679_s4 + $0x3b8] sm:$0xff]  ;;  %v2817_v46 = vpack.c.bf16 %v2059_v44, %v2058_v43 }
 0x2fd   : > { %2761 = vmatpush3.bf16.msra.mxu0 %v2760_v39  ;;  %2785 = vmatpush3.bf16.msra.mxu1 %v2784_v40  ;;  %v2056_v39 = vld [vmem:[%s3679_s4 + $0x320] sm:$0xff]  ;;  %v2057_v40 = vld [vmem:[%s3679_s4 + $0x328] sm:$0xff] }
 0x2fe   : > { %2762 = vmatprep.subr.bf16.mxu0 %v2887_v26  ;;  %2786 = vmatprep.subr.bf16.mxu1 %v2887_v26  ;;  %v2814_v41 = vpack.c.bf16 %v2057_v40, %v2056_v39 }
 0x2ff   : > { %2555 = vmatprep.mubr.msk.f32.mxu0 %vm2885_vm0, %v2884_v20  ;;  %2590 = vmatprep.mubr.msk.f32.mxu1 %vm2885_vm0, %v2884_v20 }
 0x301   : > { %2764 = vmatpush3.bf16.msra.mxu0 %v2763_v48  ;;  %2788 = vmatpush3.bf16.msra.mxu1 %v2787_v49  ;;  %v2060_v49 = vld [vmem:[%s3679_s4 + $0x340] sm:$0xff] }
 0x302   : > { %2765 = vmatprep.subr.bf16.mxu0 %v2887_v26  ;;  %2789 = vmatprep.subr.bf16.mxu1 %v2887_v26  ;;  %v2820_v54 = vpack.c.bf16 %v2061_v50, %v2060_v49 }
 0x305   : > { %2767 = vmatpush3.bf16.msra.mxu0 %v2766_v55  ;;  %2791 = vmatpush3.bf16.msra.mxu1 %v2790_v56  ;;  %v2844_v55 = vpack.c.bf16 %v2077_v52, %v2076_v51  ;;  %v2062_v56 = vld [vmem:[%s3679_s4 + $0x350] sm:$0xff] }
 0x306   : > { %2768 = vmatprep.subr.bf16.mxu0 %v2887_v26  ;;  %2792 = vmatprep.subr.bf16.mxu1 %v2887_v26  ;;  %v2823_v60 = vpack.c.bf16 %v2063_v57, %v2062_v56 }
 0x309   : > { %2770 = vmatpush3.bf16.msra.mxu0 %v2769_v61  ;;  %2794 = vmatpush3.bf16.msra.mxu1 %v2793_v62  ;;  %v2847_v61 = vpack.c.bf16 %v2079_v59, %v2078_v58  ;;  %v2064_v62 = vld [vmem:[%s3679_s4 + $0x360] sm:$0xff] }
 0x30a   : > { %2771 = vmatprep.subr.bf16.mxu0 %v2887_v26  ;;  %2795 = vmatprep.subr.bf16.mxu1 %v2887_v26  ;;  %v2826_v2 = vpack.c.bf16 %v2065_v63, %v2064_v62 }
 0x30d   : > { %2773 = vmatpush3.bf16.msra.mxu0 %v2772_v3  ;;  %2797 = vmatpush3.bf16.msra.mxu1 %v2796_v4  ;;  %v2850_v3 = vpack.c.bf16 %v2081_v1, %v2080_v0  ;;  %v2066_v4 = vld [vmem:[%s3679_s4 + $0x370] sm:$0xff] }
 0x30e   : > { %2774 = vmatprep.subr.bf16.mxu0 %v2887_v26  ;;  %2798 = vmatprep.subr.bf16.mxu1 %v2887_v26  ;;  %v2829_v9 = vpack.c.bf16 %v2067_v5, %v2066_v4 }
 0x311   : > { %2776 = vmatpush3.bf16.msra.mxu0 %v2775_v10  ;;  %2800 = vmatpush3.bf16.msra.mxu1 %v2799_v11  ;;  %v2853_v10 = vpack.c.bf16 %v2083_v8, %v2082_v7 }
 0x312   : > { %2777 = vmatprep.subr.bf16.mxu0 %v2887_v26  ;;  %2801 = vmatprep.subr.bf16.mxu1 %v2887_v26 }
 0x315   : > { %2779 = vmatpush3.bf16.msra.mxu0 %v2778_v16  ;;  %2803 = vmatpush3.bf16.msra.mxu1 %v2802_v17 }
 0x316   : > { %2780 = vmatprep.subr.bf16.mxu0 %v2887_v26  ;;  %2804 = vmatprep.subr.bf16.mxu1 %v2887_v26 }
 0x319   : > { %2782 = vmatpush3.bf16.msra.mxu0 %v2781_v24  ;;  %2806 = vmatpush3.bf16.msra.mxu1 %v2805_v6 }
 0x31a   : > { %2807 = vmatprep.subr.bf16.mxu0 %v2887_v26  ;;  %2831 = vmatprep.subr.bf16.mxu1 %v2887_v26 }
 0x31c   : > { %2556 = vmatmul.mubr.f32.vlgmr.msra.gmra.mrb[28].mxu0 %v3314_v47  ;;  %2591 = vmatmul.mubr.f32.vlgmr.msra.gmra.mrb[28].mxu1 %v3322_v53  ;;  %v2072_v47 = vld [vmem:[%s3679_s4 + $0x3a0] sm:$0xff]  ;;  %v2073_v53 = vld [vmem:[%s3679_s4 + $0x3a8] sm:$0xff] }
 0x31d   : > { %2809 = vmatpush3.bf16.msra.mxu0 %v2808_v30  ;;  %2833 = vmatpush3.bf16.msra.mxu1 %v2832_v31  ;;  %v2838_v42 = vpack.c.bf16 %v2073_v53, %v2072_v47 }
 0x31e   : > { %2810 = vmatprep.subr.bf16.mxu0 %v2887_v26  ;;  %2834 = vmatprep.subr.bf16.mxu1 %v2887_v26 }
 0x31f   : > { %2625 = vmatprep.mubr.msk.f32.mxu0 %vm2885_vm0, %v2884_v20  ;;  %2660 = vmatprep.mubr.msk.f32.mxu1 %vm2885_vm0, %v2884_v20  ;;  %v2074_v20 = vld [vmem:[%s3679_s4 + $0x3b0] sm:$0xff] }
 0x320   : > { %v2841_v48 = vpack.c.bf16 %v2075_v45, %v2074_v20 }
 0x321   : > { %2812 = vmatpush3.bf16.msra.mxu0 %v2811_v37  ;;  %2836 = vmatpush3.bf16.msra.mxu1 %v2835_v38 }
 0x322   : > { %2813 = vmatprep.subr.bf16.mxu0 %v2887_v26  ;;  %2837 = vmatprep.subr.bf16.mxu1 %v2887_v26 }
 0x325   : > { %2815 = vmatpush3.bf16.msra.mxu0 %v2814_v41  ;;  %2839 = vmatpush3.bf16.msra.mxu1 %v2838_v42 }
 0x326   : > { %2816 = vmatprep.subr.bf16.mxu0 %v2887_v26  ;;  %2840 = vmatprep.subr.bf16.mxu1 %v2887_v26 }
 0x329   : > { %2818 = vmatpush3.bf16.msra.mxu0 %v2817_v46  ;;  %2842 = vmatpush3.bf16.msra.mxu1 %v2841_v48 }
 0x32a   : > { %2819 = vmatprep.subr.bf16.mxu0 %v2887_v26  ;;  %2843 = vmatprep.subr.bf16.mxu1 %v2887_v26 }
 0x32d   : > { %2821 = vmatpush3.bf16.msra.mxu0 %v2820_v54  ;;  %2845 = vmatpush3.bf16.msra.mxu1 %v2844_v55 }
 0x32e   : > { %2822 = vmatprep.subr.bf16.mxu0 %v2887_v26  ;;  %2846 = vmatprep.subr.bf16.mxu1 %v2887_v26 }
 0x331   : > { %2824 = vmatpush3.bf16.msra.mxu0 %v2823_v60  ;;  %2848 = vmatpush3.bf16.msra.mxu1 %v2847_v61 }
 0x332   : > { %2825 = vmatprep.subr.bf16.mxu0 %v2887_v26  ;;  %2849 = vmatprep.subr.bf16.mxu1 %v2887_v26 }
 0x335   : > { %2827 = vmatpush3.bf16.msra.mxu0 %v2826_v2  ;;  %2851 = vmatpush3.bf16.msra.mxu1 %v2850_v3 }
 0x336   : > { %2828 = vmatprep.subr.bf16.mxu0 %v2887_v26  ;;  %2852 = vmatprep.subr.bf16.mxu1 %v2887_v26 }
 0x339   : > { %2830 = vmatpush3.bf16.msra.mxu0 %v2829_v9  ;;  %2854 = vmatpush3.bf16.msra.mxu1 %v2853_v10 }
 0x33c   : > { %2626 = vmatmul.mubr.f32.vlgmr.msra.gmra.mrb[30].mxu0 %v3347_v19  ;;  %2661 = vmatmul.mubr.f32.vlgmr.msra.gmra.mrb[30].mxu1 %v3368_v32 }
 0x3af   : > { %v1074_v11 = vpop.f32.mrb[24].mxu0  ;;  %v1167_v12 = vpop.f32.mrb[24].mxu1 }
 0x3b0   : > { %v1168_v13 = vadd.f32 %v1167_v12, %v1074_v11  ;;  %v2417_v14 = vpop.f32.mrb[25].mxu0  ;;  %v2452_v15 = vpop.f32.mrb[25].mxu1 }
 0x3cf   : > { %v1285_v16 = vpop.f32.mrb[26].mxu0  ;;  %v1404_v17 = vpop.f32.mrb[26].mxu1 }
 0x3d0   : > { %v1289_v18 = vadd.f32 %v1285_v16, %v1168_v13  ;;  %v2487_v21 = vpop.f32.mrb[27].mxu0  ;;  %v2522_v22 = vpop.f32.mrb[27].mxu1 }
 0x3d2   : > { %v1408_v23 = vadd.f32 %v1404_v17, %v1289_v18 }
 0x3ef   : > { %v1523_v26 = vpop.f32.mrb[28].mxu0  ;;  %v1642_v24 = vpop.f32.mrb[28].mxu1 }
 0x3f0   : > { %v1527_v6 = vadd.f32 %v1523_v26, %v1408_v23  ;;  %v2557_v25 = vpop.f32.mrb[29].mxu0  ;;  %v2592_v19 = vpop.f32.mrb[29].mxu1 }
 0x3f2   : > { %v1646_v27 = vadd.f32 %v1642_v24, %v1527_v6 }
 0x40f   : > { %v1761_v32 = vpop.f32.mrb[30].mxu0  ;;  %v1880_v28 = vpop.f32.mrb[30].mxu1 }
 0x410   : > { %v1765_v29 = vadd.f32 %v1761_v32, %v1646_v27  ;;  %v2627_v30 = vpop.f32.mrb[31].mxu0  ;;  %v2662_v31 = vpop.f32.mrb[31].mxu1 }
 0x412   : > { %v1884_v34 = vadd.f32 %v1880_v28, %v1765_v29 }
 0x414   : > { %v1892_v35 = vadd.f32 %v2084_v33, %v1884_v34 }
 0x416   : > { %1894 = vst.msk [vmem:[%s251_s23] sm:$0xff] %vm1893_vm10, %v1892_v35 }
 0x417 PF: > { %s16_s21 = sadd.s32 1, %s2882_s21  }
 0x418   : > { %p13_p5 = scmp.ge.s32.totalorder %s16_s21, 4  }
 0x41a   :  { %15 = sbr.rel (!%p13_p5) target bundleno = 1 (0x1), region = 95 }

</bundles_post_ra>
